<compile_context>
chip_gen: v6e
topology: v6e:2x2x1
jax: 0.10.0
libtpu: 0.0.40
codegen_flags: <defaults>
</compile_context>

<pallas_src>
import functools

import jax
import jax.numpy as jnp
import numpy as np
from jax import lax
from jax.experimental import pallas as pl
from jax.experimental.pallas import tpu as pltpu

_LANE = 128
_SUBLANE = 8
_SLICE_ROWS = 256            # inner accumulation slice: 256x128 f32 = 128 KiB
_DEFAULT_TILE_ROWS = 2048    # 2048x128 f32 = 1 MiB/block; x2 inputs x2 buffers = 4 MiB VMEM
_DEFAULT_MIN_PALLAS_ELEMS = 32768   # below this, pure-XLA beats kernel-launch overhead


def _cdiv(a, b):
    return -(-a // b)


def _round_up(a, b):
    return _cdiv(a, b) * b


def _softplus(x):
    # numerically-stable softplus == BCEWithLogits against a constant 0/1 target
    return jnp.maximum(x, 0.0) + jnp.log1p(jnp.exp(-jnp.abs(x)))


def _sigmoid(x):
    # 0.5*tanh(0.5x)+0.5: one EUP transcendental instead of exp + reciprocal.
    return 0.5 * jnp.tanh(0.5 * x) + 0.5


def _elementwise(a, b, mode):
    """Per-element loss terms: f_a applied to `a` (fake/out), f_b to `b` (real/target)."""
    if mode == "gan_logit":
        # BCEWithLogits(a, 0) -> softplus(a); BCEWithLogits(b, 1) -> softplus(-b)
        return _softplus(a), _softplus(-b)
    if mode == "gan_prob":
        # BCE(a, 0) -> -log(1-a); BCE(b, 1) -> -log(b); torch clamps each log at -100
        fa = -jnp.maximum(jnp.log(1.0 - a), -100.0)
        fb = -jnp.maximum(jnp.log(b), -100.0)
        return fa, fb
    if mode == "wgan_logit":
        return _sigmoid(a), _sigmoid(b)
    if mode == "wgan":
        return a, b
    raise ValueError(f"unknown mode {mode}")


def _accum_tile(a_ref, b_ref, *, mode, tile_rows, rem_valid, masked):
    """Reduce one (tile_rows,128) tile of each input into (8,128) f32 partials.

    The tile is processed in _SLICE_ROWS-row static slices (fully unrolled),
    keeping the elementwise f32 intermediates small and the dependent add
    chain into the accumulator short.  `rem_valid` is the number of valid
    elements within this tile (only used when `masked`).
    """
    n_inner = tile_rows // _SLICE_ROWS
    acc_a = jnp.zeros((_SUBLANE, _LANE), jnp.float32)
    acc_b = jnp.zeros((_SUBLANE, _LANE), jnp.float32)
    for s in range(n_inner):  # static, fully-unrolled inner loop
        r0 = s * _SLICE_ROWS
        a = a_ref[pl.ds(r0, _SLICE_ROWS), :].astype(jnp.float32)
        b = b_ref[pl.ds(r0, _SLICE_ROWS), :].astype(jnp.float32)
        fa, fb = _elementwise(a, b, mode)
        if masked:  # only ever instantiated for the final (ragged) tile
            row = lax.broadcasted_iota(jnp.int32, (_SLICE_ROWS, _LANE), 0)
            lane = lax.broadcasted_iota(jnp.int32, (_SLICE_ROWS, _LANE), 1)
            flat = (r0 + row) * _LANE + lane      # offset within this tile (< 2^31)
            keep = flat < rem_valid
            fa = jnp.where(keep, fa, 0.0)
            fb = jnp.where(keep, fb, 0.0)
        acc_a = acc_a + fa.reshape(_SLICE_ROWS // _SUBLANE, _SUBLANE, _LANE).sum(axis=0)
        acc_b = acc_b + fb.reshape(_SLICE_ROWS // _SUBLANE, _SUBLANE, _LANE).sum(axis=0)
    return acc_a, acc_b


def _two_sum_kernel(a_ref, b_ref, sa_ref, sb_ref, *,
                    mode, tile_rows, num_blocks, rem_valid, needs_mask):
    """Accumulates sum(f_a(a)) and sum(f_b(b)) into resident (8,128) partials."""
    i = pl.program_id(0)

    @pl.when(i == 0)
    def _():
        sa_ref[...] = jnp.zeros_like(sa_ref)
        sb_ref[...] = jnp.zeros_like(sb_ref)

    if needs_mask:  # static: only true when the last tile straddles n_valid
        @pl.when(i == num_blocks - 1)
        def _():
            da, db = _accum_tile(a_ref, b_ref, mode=mode, tile_rows=tile_rows,
                                 rem_valid=rem_valid, masked=True)
            sa_ref[...] += da
            sb_ref[...] += db

        @pl.when(i != num_blocks - 1)
        def _():
            da, db = _accum_tile(a_ref, b_ref, mode=mode, tile_rows=tile_rows,
                                 rem_valid=rem_valid, masked=False)
            sa_ref[...] += da
            sb_ref[...] += db
    else:
        da, db = _accum_tile(a_ref, b_ref, mode=mode, tile_rows=tile_rows,
                             rem_valid=rem_valid, masked=False)
        sa_ref[...] += da
        sb_ref[...] += db


def _jax_two_sums(a, b, mode):
    fa, fb = _elementwise(a.astype(jnp.float32), b.astype(jnp.float32), mode)
    return jnp.sum(fa), jnp.sum(fb)


def _pallas_two_sums(a, b, mode, *, tile_rows=_DEFAULT_TILE_ROWS,
                     min_pallas_elems=_DEFAULT_MIN_PALLAS_ELEMS):
    """Returns (sum f_a(a), sum f_b(b)) via a tiled single-pass Pallas reduction."""
    assert a.shape == b.shape, "this helper assumes matching shapes"
    n = int(a.size)
    if n < min_pallas_elems:
        # Tiny discriminator maps: kernel launch + reshape overhead dominates.
        return _jax_two_sums(a, b, mode)

    a_flat = a.reshape(-1)
    b_flat = b.reshape(-1)
    if a_flat.dtype not in (jnp.float32, jnp.bfloat16):
        a_flat = a_flat.astype(jnp.float32)
    if b_flat.dtype not in (jnp.float32, jnp.bfloat16):
        b_flat = b_flat.astype(jnp.float32)

    # Lane alignment: a pad copy only happens when n is not a multiple of 128
    # (rare for real maps).  Otherwise the reshape below is free and the
    # kernel masks the ragged final tile instead of padding to tile multiples.
    padded_n = _round_up(n, _LANE)
    if padded_n != n:
        a_flat = jnp.pad(a_flat, (0, padded_n - n))
        b_flat = jnp.pad(b_flat, (0, padded_n - n))
    rows = padded_n // _LANE

    tile_rows = max(_SLICE_ROWS, _round_up(min(tile_rows, rows), _SLICE_ROWS))
    num_blocks = _cdiv(rows, tile_rows)
    tile_elems = tile_rows * _LANE
    needs_mask = (num_blocks * tile_elems != n)
    rem_valid = n - (num_blocks - 1) * tile_elems   # valid elements in the final tile

    a2 = a_flat.reshape(rows, _LANE)
    b2 = b_flat.reshape(rows, _LANE)

    kernel = functools.partial(
        _two_sum_kernel, mode=mode, tile_rows=tile_rows, num_blocks=num_blocks,
        rem_valid=rem_valid, needs_mask=needs_mask)

    bytes_accessed = int(a2.size * a2.dtype.itemsize + b2.size * b2.dtype.itemsize
                         + 2 * _SUBLANE * _LANE * 4)
    transcendentals = {"gan_logit": 4 * n, "gan_prob": 2 * n,
                       "wgan_logit": 2 * n, "wgan": 0}[mode]
    cost = pl.CostEstimate(flops=10 * n, transcendentals=transcendentals,
                           bytes_accessed=bytes_accessed)

    sa, sb = pl.pallas_call(
        kernel,
        out_shape=(
            jax.ShapeDtypeStruct((_SUBLANE, _LANE), jnp.float32),
            jax.ShapeDtypeStruct((_SUBLANE, _LANE), jnp.float32),
        ),
        grid_spec=pltpu.PrefetchScalarGridSpec(
            num_scalar_prefetch=0,
            grid=(num_blocks,),
            in_specs=[
                pl.BlockSpec((tile_rows, _LANE), lambda i: (i, 0)),
                pl.BlockSpec((tile_rows, _LANE), lambda i: (i, 0)),
            ],
            out_specs=[
                pl.BlockSpec((_SUBLANE, _LANE), lambda i: (0, 0)),
                pl.BlockSpec((_SUBLANE, _LANE), lambda i: (0, 0)),
            ],
        ),
        compiler_params=pltpu.CompilerParams(
            # Single reduction axis feeding resident accumulators.
            # TODO(synk): v7x two-TensorCore sharding (CORE_PARALLEL lead axis).
            dimension_semantics=("arbitrary",),
        ),
        cost_estimate=cost,
    )(a2, b2)
    return jnp.sum(sa), jnp.sum(sb)


class DiscLoss:
    """JAX/Pallas port of the PyTorch DiscLoss module (forward pass only)."""

    def __init__(self, loss_fn: str = "gan", relativistic: bool = False, logit: bool = True,
                 *, pallas_tile_rows: int = _DEFAULT_TILE_ROWS,
                 pallas_min_elems: int = _DEFAULT_MIN_PALLAS_ELEMS):
        self.loss_fn = loss_fn
        self.relativistic = relativistic
        self.logit = logit
        self.pallas_tile_rows = pallas_tile_rows
        self.pallas_min_elems = pallas_min_elems

    def _two_sums(self, a, b, mode):
        return _pallas_two_sums(a, b, mode, tile_rows=self.pallas_tile_rows,
                                min_pallas_elems=self.pallas_min_elems)

    def __call__(self, out, target):
        if self.relativistic:
            # TODO(synk): fuse the (1,C,H,W) batch-mean shift into the kernel's
            # input reads (extra broadcast-indexed inputs) to avoid the two
            # materialized full-size shifted copies in HBM.
            a = out - jnp.mean(target, axis=0, keepdims=True)   # fake logits vs 0
            b = target - jnp.mean(out, axis=0, keepdims=True)   # real logits vs 1
            mode = "gan_logit" if self.logit else "gan_prob"
            sa, sb = self._two_sums(a, b, mode)
            return sb / b.size + sa / a.size
        elif self.loss_fn == "gan":
            mode = "gan_logit" if self.logit else "gan_prob"
            sa, sb = self._two_sums(out, target, mode)
            return sa / out.size + sb / target.size
        elif self.loss_fn == "wgan":
            mode = "wgan_logit" if self.logit else "wgan"
            sa, sb = self._two_sums(out, target, mode)
            return -1.0 * (sb / target.size - sa / out.size)
        else:
            raise ValueError(f"unsupported loss_fn {self.loss_fn}")


# ----------------------- pure-JAX reference (for checking) -----------------------

def _ref_disc_loss(out, target, loss_fn="gan", relativistic=False, logit=True):
    sp = lambda x: jnp.maximum(x, 0.0) + jnp.log1p(jnp.exp(-jnp.abs(x)))
    bce0 = lambda x: -jnp.maximum(jnp.log(1.0 - x), -100.0)   # BCE against zeros
    bce1 = lambda x: -jnp.maximum(jnp.log(x), -100.0)         # BCE against ones
    if relativistic:
        a = out - jnp.mean(target, axis=0, keepdims=True)
        b = target - jnp.mean(out, axis=0, keepdims=True)
        if logit:
            return jnp.mean(sp(-b)) + jnp.mean(sp(a))
        return jnp.mean(bce1(b)) + jnp.mean(bce0(a))
    if loss_fn == "gan":
        if logit:
            return jnp.mean(sp(out)) + jnp.mean(sp(-target))
        return jnp.mean(bce0(out)) + jnp.mean(bce1(target))
    if loss_fn == "wgan":
        if logit:
            return -1.0 * (jnp.mean(jax.nn.sigmoid(target)) - jnp.mean(jax.nn.sigmoid(out)))
        return -1.0 * (jnp.mean(target) - jnp.mean(out))
    raise ValueError(loss_fn)


if __name__ == "__main__":
    key = jax.random.PRNGKey(0)
    ks = jax.random.split(key, 8)

    def check(got, ref, rtol=1e-5, atol=1e-5):
        np.testing.assert_allclose(np.asarray(got), np.asarray(ref), rtol=rtol, atol=atol)

    # ---- small PatchGAN-sized maps: fast path (pure JAX), all branches ----
    out_s = jax.random.normal(ks[0], (2, 4, 16, 16), dtype=jnp.float32)
    tgt_s = jax.random.normal(ks[1], (2, 4, 16, 16), dtype=jnp.float32)
    check(DiscLoss("gan", False, True)(out_s, tgt_s),
          _ref_disc_loss(out_s, tgt_s, "gan", False, True))
    check(DiscLoss("wgan", False, True)(out_s, tgt_s),
          _ref_disc_loss(out_s, tgt_s, "wgan", False, True))
    check(DiscLoss("wgan", False, False)(out_s, tgt_s),
          _ref_disc_loss(out_s, tgt_s, "wgan", False, False))
    check(DiscLoss("gan", True, True)(out_s, tgt_s),
          _ref_disc_loss(out_s, tgt_s, "gan", True, True))
    p_out, p_tgt = jax.nn.sigmoid(out_s), jax.nn.sigmoid(tgt_s)
    check(DiscLoss("gan", False, False)(p_out, p_tgt),
          _ref_disc_loss(p_out, p_tgt, "gan", False, False))

    # ---- Pallas path: 128-aligned maps, multi-tile (small tile keeps shapes small) ----
    out_l = jax.random.normal(ks[2], (2, 8, 64, 64), dtype=jnp.float32)   # 65536 elems
    tgt_l = jax.random.normal(ks[3], (2, 8, 64, 64), dtype=jnp.float32)
    dl = DiscLoss("gan", False, True, pallas_tile_rows=256)               # 512 rows -> 2 tiles
    loss = jax.block_until_ready(dl(out_l, tgt_l))
    check(loss, _ref_disc_loss(out_l, tgt_l, "gan", False, True))

    # default tile, wgan-logit and relativistic branches through the kernel
    loss_w = jax.block_until_ready(DiscLoss("wgan", False, True)(out_l, tgt_l))
    check(loss_w, _ref_disc_loss(out_l, tgt_l, "wgan", False, True))
    loss_rel = jax.block_until_ready(DiscLoss("gan", True, True)(out_l, tgt_l))
    check(loss_rel, _ref_disc_loss(out_l, tgt_l, "gan", True, True))

    # ---- Pallas path: 128-aligned but tile-ragged row count (masked last tile, no pad copy) ----
    out_m = jax.random.normal(ks[4], (2, 5, 50, 128), dtype=jnp.float32)  # 64000 elems
    tgt_m = jax.random.normal(ks[5], (2, 5, 50, 128), dtype=jnp.float32)
    loss_m = jax.block_until_ready(DiscLoss("gan", False, True)(out_m, tgt_m))
    check(loss_m, _ref_disc_loss(out_m, tgt_m, "gan", False, True))

    # ---- Pallas path: non-128-multiple element count (pad-to-lane + masked tile) ----
    out_r = jax.random.normal(ks[6], (2, 3, 67, 131), dtype=jnp.float32)  # 52662 elems
    tgt_r = jax.random.normal(ks[7], (2, 3, 67, 131), dtype=jnp.float32)
    loss_r = jax.block_until_ready(DiscLoss("gan", False, True)(out_r, tgt_r))
    check(loss_r, _ref_disc_loss(out_r, tgt_r, "gan", False, True))

    # ---- Pallas path: bf16 streaming (f32 accumulate inside the kernel) ----
    out_h, tgt_h = out_l.astype(jnp.bfloat16), tgt_l.astype(jnp.bfloat16)
    loss_h = jax.block_until_ready(DiscLoss("gan", False, True)(out_h, tgt_h))
    ref_h = _ref_disc_loss(out_h.astype(jnp.float32), tgt_h.astype(jnp.float32),
                           "gan", False, True)
    check(loss_h, ref_h, rtol=1e-4, atol=1e-4)

    print("KERNEL_OK")
</pallas_src>

<mosaic_0001>
module attributes {stable_mosaic.version = 11 : i64} {
  func.func @_two_sum_kernel(%arg0: i32, %arg1: memref<256x128xf32, #tpu.memory_space<vmem>>, %arg2: memref<256x128xf32, #tpu.memory_space<vmem>>, %arg3: memref<8x128xf32, #tpu.memory_space<vmem>>, %arg4: memref<8x128xf32, #tpu.memory_space<vmem>>) attributes {dimension_semantics = [#tpu.dimension_semantics<arbitrary>], iteration_bounds = array<i64: 2>, scalar_prefetch = 0 : i64, scratch_operands = 0 : i64, tpu.core_type = #tpu.core_type<tc>, window_params = [{transform_indices = @transform_0, window_bounds = array<i64: 256, 128>}, {transform_indices = @transform_1, window_bounds = array<i64: 256, 128>}, {pipeline_mode = #tpu.pipeline_mode<synchronous>, transform_indices = @transform_2, window_bounds = array<i64: 8, 128>}, {pipeline_mode = #tpu.pipeline_mode<synchronous>, transform_indices = @transform_3, window_bounds = array<i64: 8, 128>}]} {
    %c0_i32 = arith.constant 0 : i32
    %0 = arith.cmpi eq, %arg0, %c0_i32 : i32
    %1 = arith.extui %0 : i1 to i32
    %c0_i32_0 = arith.constant 0 : i32
    %2 = arith.cmpi ne, %1, %c0_i32_0 : i32
    scf.if %2 {
      %cst_20 = arith.constant 0.000000e+00 : f32
      %37 = vector.broadcast %cst_20 : f32 to vector<8x128xf32>
      %c0_21 = arith.constant 0 : index
      %c0_22 = arith.constant 0 : index
      %38 = vector.load %arg3[%c0_21, %c0_22] : memref<8x128xf32, #tpu.memory_space<vmem>>, vector<8x128xf32>
      tpu.vector_store %arg3[%c0_21, %c0_22], %37 {strides = array<i32>} : memref<8x128xf32, #tpu.memory_space<vmem>>, vector<8x128xf32>,
      %cst_23 = arith.constant 0.000000e+00 : f32
      %39 = vector.broadcast %cst_23 : f32 to vector<8x128xf32>
      %c0_24 = arith.constant 0 : index
      %c0_25 = arith.constant 0 : index
      %40 = vector.load %arg4[%c0_24, %c0_25] : memref<8x128xf32, #tpu.memory_space<vmem>>, vector<8x128xf32>
      tpu.vector_store %arg4[%c0_24, %c0_25], %39 {strides = array<i32>} : memref<8x128xf32, #tpu.memory_space<vmem>>, vector<8x128xf32>,
    } else {
    }
    %cst = arith.constant 0.000000e+00 : f32
    %3 = vector.broadcast %cst : f32 to vector<8x128xf32>
    %cst_1 = arith.constant 0.000000e+00 : f32
    %4 = vector.broadcast %cst_1 : f32 to vector<8x128xf32>
    %c0 = arith.constant 0 : index
    %c0_2 = arith.constant 0 : index
    %5 = vector.load %arg1[%c0, %c0_2] : memref<256x128xf32, #tpu.memory_space<vmem>>, vector<256x128xf32>
    %c0_3 = arith.constant 0 : index
    %c0_4 = arith.constant 0 : index
    %6 = vector.load %arg2[%c0_3, %c0_4] : memref<256x128xf32, #tpu.memory_space<vmem>>, vector<256x128xf32>
    %cst_5 = arith.constant 0.000000e+00 : f32
    %7 = vector.broadcast %cst_5 : f32 to vector<256x128xf32>
    %8 = arith.maximumf %5, %7 : vector<256x128xf32>
    %9 = math.absf %5 : vector<256x128xf32>
    %cst_6 = arith.constant 0.000000e+00 : f32
    %10 = vector.broadcast %cst_6 : f32 to vector<256x128xf32>
    %11 = arith.subf %10, %9 : vector<256x128xf32>
    %12 = math.exp %11 : vector<256x128xf32>
    %13 = math.log1p %12 : vector<256x128xf32>
    %14 = arith.addf %8, %13 : vector<256x128xf32>
    %cst_7 = arith.constant 0.000000e+00 : f32
    %15 = vector.broadcast %cst_7 : f32 to vector<256x128xf32>
    %16 = arith.subf %15, %6 : vector<256x128xf32>
    %cst_8 = arith.constant 0.000000e+00 : f32
    %17 = vector.broadcast %cst_8 : f32 to vector<256x128xf32>
    %18 = arith.maximumf %16, %17 : vector<256x128xf32>
    %19 = math.absf %16 : vector<256x128xf32>
    %cst_9 = arith.constant 0.000000e+00 : f32
    %20 = vector.broadcast %cst_9 : f32 to vector<256x128xf32>
    %21 = arith.subf %20, %19 : vector<256x128xf32>
    %22 = math.exp %21 : vector<256x128xf32>
    %23 = math.log1p %22 : vector<256x128xf32>
    %24 = arith.addf %18, %23 : vector<256x128xf32>
    %25 = vector.shape_cast %14 : vector<256x128xf32> to vector<32x8x128xf32>
    %cst_10 = arith.constant dense<0.000000e+00> : vector<8x128xf32>
    %26 = vector.multi_reduction <add>, %25, %cst_10 [0] : vector<32x8x128xf32> to vector<8x128xf32>
    %27 = arith.addf %3, %26 : vector<8x128xf32>
    %28 = vector.shape_cast %24 : vector<256x128xf32> to vector<32x8x128xf32>
    %cst_11 = arith.constant dense<0.000000e+00> : vector<8x128xf32>
    %29 = vector.multi_reduction <add>, %28, %cst_11 [0] : vector<32x8x128xf32> to vector<8x128xf32>
    %30 = arith.addf %4, %29 : vector<8x128xf32>
    %c0_12 = arith.constant 0 : index
    %c0_13 = arith.constant 0 : index
    %31 = vector.load %arg3[%c0_12, %c0_13] : memref<8x128xf32, #tpu.memory_space<vmem>>, vector<8x128xf32>
    %32 = arith.addf %31, %27 : vector<8x128xf32>
    %c0_14 = arith.constant 0 : index
    %c0_15 = arith.constant 0 : index
    %33 = vector.load %arg3[%c0_14, %c0_15] : memref<8x128xf32, #tpu.memory_space<vmem>>, vector<8x128xf32>
    tpu.vector_store %arg3[%c0_14, %c0_15], %32 {strides = array<i32>} : memref<8x128xf32, #tpu.memory_space<vmem>>, vector<8x128xf32>,
    %c0_16 = arith.constant 0 : index
    %c0_17 = arith.constant 0 : index
    %34 = vector.load %arg4[%c0_16, %c0_17] : memref<8x128xf32, #tpu.memory_space<vmem>>, vector<8x128xf32>
    %35 = arith.addf %34, %30 : vector<8x128xf32>
    %c0_18 = arith.constant 0 : index
    %c0_19 = arith.constant 0 : index
    %36 = vector.load %arg4[%c0_18, %c0_19] : memref<8x128xf32, #tpu.memory_space<vmem>>, vector<8x128xf32>
    tpu.vector_store %arg4[%c0_18, %c0_19], %35 {strides = array<i32>} : memref<8x128xf32, #tpu.memory_space<vmem>>, vector<8x128xf32>,
    return
  }
  func.func @transform_0(%arg0: i32) -> (i32, i32) {
    %c0_i32 = arith.constant 0 : i32
    %c0_i32_0 = arith.constant 0 : i32
    return %arg0, %c0_i32 : i32, i32
  }
  func.func @transform_1(%arg0: i32) -> (i32, i32) {
    %c0_i32 = arith.constant 0 : i32
    %c0_i32_0 = arith.constant 0 : i32
    return %arg0, %c0_i32 : i32, i32
  }
  func.func @transform_2(%arg0: i32) -> (i32, i32) {
    %c0_i32 = arith.constant 0 : i32
    %c0_i32_0 = arith.constant 0 : i32
    %c0_i32_1 = arith.constant 0 : i32
    return %c0_i32, %c0_i32_0 : i32, i32
  }
  func.func @transform_3(%arg0: i32) -> (i32, i32) {
    %c0_i32 = arith.constant 0 : i32
    %c0_i32_0 = arith.constant 0 : i32
    %c0_i32_1 = arith.constant 0 : i32
    return %c0_i32, %c0_i32_0 : i32, i32
  }
}

</mosaic_0001>

<bundles_post_ra>
// kernel: tpu_custom_call.1
= control target key start
LH: loop header
LB: loop body
LE: loop exit
PB: predicated region body
PF: predicated region fallthrough
CT: control target
= control target key end

     0   :  { %9 = vsyncpa [#allocation3], 0  ;;  %s4019_s0 = inlined_call_operand.hbm [shape: f32[512,128], index: 0, kind: input, shape index: {}]   ;;  %s4020_s1 = inlined_call_operand.hbm [shape: f32[512,128], index: 1, kind: input, shape index: {}]   ;;  %s4021_s2 = inlined_call_operand.hbm [shape: f32[8,128], index: 2, kind: output, shape index: {0}]   ;;  %s4022_s3 = inlined_call_operand.hbm [shape: f32[8,128], index: 3, kind: output, shape index: {1}]  }
   0x1   :  { %11 = vsyncpa [#allocation3 + $0x1], 0 }
   0x2   :  { %12 = vsyncpa [#allocation6], 0 }
   0x3   :  { %14 = vsyncpa [#allocation6 + $0x1], 0 }
   0x4   :  { %15 = vsyncpa [#allocation4], 0 }
   0x5   :  { %16 = vsyncpa [#allocation9], 0  ;;  %s1969_s12 = smov 0   ;;  %s1971_s13 = smov 0  }
   0x6   :  { %s1973_s14 = smov 0   ;;  %s1975_s15 = smov 0  }
   0x7 LB: > { %s1988_s16 = sadd.s32 4294967295, %s1940_s15   ;;  %s1991_s17 = sadd.s32 1, %s1940_s15   ;;  %s1940_s15 = sphi %s1975_s15, %s4759_s15   ;;  %s1936_s14 = sphi %s1973_s14, %s4758_s14   ;;  %s1932_s13 = sphi %s1971_s13, %s4757_s13   ;;  %s1928_s12 = sphi %s1969_s12, %s4756_s12  }
   0x8   : > { %s26_s18 = ssub.s32 %s1940_s15, %s1991_s17  ;;  %s29_s19 = sadd.s32 1, %s1936_s14 }
   0x9   : > { %p27_p0 = scmp.eq.s32.totalorder %s26_s18, 0  ;;  %p36_p1 = scmp.ne.s32.totalorder %s1936_s14, %s1932_s13 }
   0xa   : > { %p37_p2 = scmp.eq.s32.totalorder %s1940_s15, 0  ;;  %p42_p3 = scmp.ne.s32.totalorder %s1932_s13, %s1928_s12 }
   0xb   : > { %s2001_s20 = scalar_select %p27_p0, %s1936_s14, %s29_s19  }
   0xc   : > { %p38_p4 = por %p37_p2, %p36_p1  ;;  %p43_p5 = scmp.eq.s32.totalorder %s1988_s16, 0 }
   0xd   : > { %p1492_p6 = scmp.lt.s32.totalorder %s1940_s15, 2  ;;  %s2010_s22 = sand.u32 1, %s1936_s14  }
   0xe   : > { %p2005_p7 = por %p43_p5, %p42_p3  ;;  %s1455_s23 = sshll.u32 %s2010_s22, 8 }
   0xf   : > { %s1471_s24 = sshll.u32 %s1940_s15, 12  ;;  %s138_s28 = scalar_lea.vmem [#allocation2], %s1455_s23 }
  0x10   : > { %s4168_s21 = scalar_select %p2005_p7, 1, 0 }
  0x11   : > { %s2019_s27 = scalar_lea.hbm %s4019_s0, %s1471_s24  ;;  %s145_s29 = sshll.u32 %s138_s28, 4  ;;  %s2023_s29 = int_to_ptr.vmem [resolvable:$true] %s145_s29 }
  0x12   : > { %p2025_p8 = pnand %p1492_p6, %p38_p4  ;;  %s135_s4 = scalar_lea.sflag [#allocation3], %s2010_s22 }
  0x13   : > { %s1790_s5 = scalar_lea.hbm %s2019_s27, 4096  ;;  %s1795_s8 = scalar_lea.hbm %s4019_s0, 8192 }
  0x14   : > { %p1791_p10 = scmp.ne.s32.totalorder %s2019_s27, %s1790_s5  ;;  %p1792_p11 = pneg %p2025_p8 }
  0x15   : > { %p1796_p0 = scmp.lt.s32.totalorder %s2019_s27, %s4019_s0  ;;  %p1797_p1 = scmp.lt.s32.totalorder %s1795_s8, %s1790_s5 }
  0x16   : > { %p1793_p12 = pnand %p1792_p11, %p1791_p10 }
  0x17   : > { %p1798_p2 = por %p1797_p1, %p1796_p0 }
  0x18   : > { %p1794_p13 = pneg %p1793_p12 }
  0x1a   : > { %p1799_p3 = pnand %p1798_p2, %p1794_p13 }
  0x1c   : > { %1802 = shalt.err (!%p1799_p3)
}
  0x1d   : > { %s1803_s11 = scalar_lea.vmem %s2023_s29, 4096  ;;  %s1942_s12 = smov [#allocation2]  }
  0x1e   : > { %p1804_p4 = scmp.ne.s32.totalorder %s2023_s29, %s1803_s11  ;;  %s1808_s18 = sshll.u32 %s1942_s12, 4  ;;  %s1809_s18 = int_to_ptr.vmem [resolvable:$false] %s1808_s18 }
  0x1f   : > { %s1810_s19 = scalar_lea.vmem %s1809_s18, 8192  ;;  %p1811_p10 = scmp.lt.s32.totalorder %s2023_s29, %s1809_s18 }
  0x20   : > { %p1806_p5 = pnand %p1804_p4, %p1792_p11  ;;  %p1812_p12 = scmp.lt.s32.totalorder %s1810_s19, %s1803_s11 }
  0x22   : > { %p1807_p6 = pneg %p1806_p5  ;;  %p1813_p9 = por %p1812_p12, %p1811_p10 }
  0x24   : > { %p1814_p0 = pnand %p1813_p9, %p1807_p6 }
  0x26   : > { %1817 = shalt.err (!%p1814_p0)
}
  0x27   : > { %s1943_s25 = smov 128   ;;  %s1944_s26 = smov 8  }
  0x28   : > { %1488 = dma.hbm_to_vmem [thread:$0]  (!%p2025_p8), %s2019_s27, 4096, %s2023_s29, %s135_s4, %s1943_s25, %s1943_s25, %s1944_s26  }
  0x29   : > { %p174_p9 = scmp.lt.s32.totalorder %s1940_s15, 3  ;;  %s2066_s6 = scalar_lea.hbm %s4020_s1, %s1471_s24 }
  0x2a   : > { %p4170_p13 = scmp.ge.s32.totalorder %s1940_s15, 1  ;;  %s159_s8 = scalar_lea.vmem [#allocation5], %s1455_s23 }
  0x2b   : > { %s166_s9 = sshll.u32 %s159_s8, 4  ;;  %s156_s27 = scalar_lea.sflag [#allocation6], %s2010_s22  ;;  %s2076_s9 = int_to_ptr.vmem [resolvable:$true] %s166_s9 }
  0x2c   : > { %p2070_p1 = pnand %p4170_p13, %p174_p9  ;;  %s1818_s29 = scalar_lea.hbm %s2066_s6, 4096 }
  0x2d   : > { %p1819_p2 = scmp.ne.s32.totalorder %s2066_s6, %s1818_s29  ;;  %s1823_s4 = scalar_lea.hbm %s4020_s1, 8192 }
  0x2e   : > { %p1824_p5 = scmp.lt.s32.totalorder %s2066_s6, %s4020_s1  ;;  %p1825_p6 = scmp.lt.s32.totalorder %s1823_s4, %s1818_s29 }
  0x2f   : > { %p1821_p3 = pnand %p1819_p2, %p1792_p11 }
  0x30   : > { %p1826_p10 = por %p1825_p6, %p1824_p5 }
  0x31   : > { %p1822_p4 = pneg %p1821_p3 }
  0x33   : > { %p1827_p12 = pnand %p1826_p10, %p1822_p4 }
  0x35   : > { %1830 = shalt.err (!%p1827_p12)
}
  0x36   : > { %s1831_s22 = scalar_lea.vmem %s2076_s9, 4096  ;;  %s1945_s23 = smov [#allocation5]  }
  0x37   : > { %p1832_p0 = scmp.ne.s32.totalorder %s2076_s9, %s1831_s22  ;;  %s1836_s12 = sshll.u32 %s1945_s23, 4  ;;  %s1837_s12 = int_to_ptr.vmem [resolvable:$false] %s1836_s12 }
  0x38   : > { %s1838_s18 = scalar_lea.vmem %s1837_s12, 8192  ;;  %p1839_p2 = scmp.lt.s32.totalorder %s2076_s9, %s1837_s12 }
  0x39   : > { %p1834_p9 = pnand %p1832_p0, %p1792_p11  ;;  %p1840_p3 = scmp.lt.s32.totalorder %s1838_s18, %s1831_s22 }
  0x3b   : > { %p1835_p13 = pneg %p1834_p9  ;;  %p1841_p7 = por %p1840_p3, %p1839_p2 }
  0x3d   : > { %p1842_p5 = pnand %p1841_p7, %p1835_p13 }
  0x3f   : > { %1845 = shalt.err (!%p1842_p5)
}
  0x40   : > { %1491 = dma.hbm_to_vmem [thread:$0]  (!%p2025_p8), %s2066_s6, 4096, %s2076_s9, %s156_s27, %s1943_s25, %s1943_s25, %s1944_s26  }
  0x41   : > { %178 = sbr.rel (%p2070_p1) target bundleno = 408 (0x198), region = 28 }
  0x46   : > { %s180_s19 = sand.u32 1, %s1932_s13   ;;  %p4172_p7 = scmp.ne.s32.totalorder %s4168_s21, 0 }
  0x47   : > { %s1462_s28 = sshll.u32 %s180_s19, 8  ;;  %s181_s5 = scalar_lea.sflag [#allocation3], %s180_s19 }
  0x48   : > { %s2107_s8 = scalar_lea.vmem [#allocation2], %s1462_s28 }
  0x49   : > { %1911 = dma.done.wait (%p4172_p7), %s181_s5, 4096  }
  0x4a   : > { %1913 = vsyncadd (%p4172_p7), %s181_s5, 4294963200  ;;  %s190_s30 = scalar_lea.sflag [#allocation6], %s180_s19  ;;  %s2113_s29 = scalar_lea.vmem [#allocation5], %s1462_s28 }
  0x4b   : > { %1915 = dma.done.wait (%p4172_p7), %s190_s30, 4096  }
  0x4c   : > { %1917 = vsyncadd (%p4172_p7), %s190_s30, 4294963200  ;;  %p1464_p8 = scmp.ne.s32.totalorder %s1988_s16, 0 }
  0x4e   : > { %221 = sbr.rel (%p1464_p8) target bundleno = 85 (0x55), region = 40 }
  0x53   : > { %v1946_v0 = vmov 0.0  }
  0x54   : > { %222 = vst [vmem:[#allocation7] sm:$0xff] %v1946_v0  ;;  %223 = vst [vmem:[#allocation8] sm:$0xff] %v1946_v0 }
  0x55 PF: > { %v2121_v1 = vld [vmem:[%s2107_s8] sm:$0xff]  ;;  %v2124_v2 = vld [vmem:[%s2107_s8 + $0x8] sm:$0xff]  ;;  %v2127_v3 = vld [vmem:[%s2107_s8 + $0x10] sm:$0xff]  ;;  %s1947_s21 = smov [#allocation7]   ;;  %p1493_p11 = scmp.eq.s32.totalorder %s1988_s16, 1 }
  0x56   : > { %4173 = vst [vmem:[#allocation14_spill] sm:$0xff] %v2121_v1  ;;  %4174 = vst [vmem:[#allocation15_spill] sm:$0xff] %v2124_v2  ;;  %v2130_v4 = vld [vmem:[%s2107_s8 + $0x18] sm:$0xff]  ;;  %v2133_v5 = vld [vmem:[%s2107_s8 + $0x20] sm:$0xff]  ;;  %v320_v62 = vand.u32 2147483647, %v2121_v1 }
  0x57   : > { %4175 = vst [vmem:[#allocation16_spill] sm:$0xff] %v2127_v3  ;;  %4176 = vst [vmem:[#allocation17_spill] sm:$0xff] %v2130_v4  ;;  %v2136_v6 = vld [vmem:[%s2107_s8 + $0x28] sm:$0xff]  ;;  %v2140_v8 = vld [vmem:[%s2107_s8 + $0x30] sm:$0xff]  ;;  %v321_v0 = vand.u32 2147483647, %v2124_v2 }
  0x58   : > { %4177 = vst [vmem:[#allocation18_spill] sm:$0xff] %v2133_v5  ;;  %4178 = vst [vmem:[#allocation19_spill] sm:$0xff] %v2136_v6  ;;  %v2143_v9 = vld [vmem:[%s2107_s8 + $0x38] sm:$0xff]  ;;  %v2146_v10 = vld [vmem:[%s2107_s8 + $0x40] sm:$0xff]  ;;  %v322_v55 = vand.u32 2147483647, %v2127_v3 }
  0x59   : > { %4179 = vst [vmem:[#allocation20_spill] sm:$0xff] %v2140_v8  ;;  %4180 = vst [vmem:[#allocation21_spill] sm:$0xff] %v2143_v9  ;;  %v2152_v14 = vld [vmem:[%s2107_s8 + $0x48] sm:$0xff]  ;;  %v2155_v15 = vld [vmem:[%s2107_s8 + $0x50] sm:$0xff]  ;;  %v323_v54 = vand.u32 2147483647, %v2130_v4 }
  0x5a   : > { %4181 = vst [vmem:[#allocation22_spill] sm:$0xff] %v2146_v10  ;;  %4182 = vst [vmem:[#allocation23_spill] sm:$0xff] %v2152_v14  ;;  %v2158_v16 = vld [vmem:[%s2107_s8 + $0x58] sm:$0xff]  ;;  %v2164_v20 = vld [vmem:[%s2107_s8 + $0x60] sm:$0xff]  ;;  %v324_v49 = vand.u32 2147483647, %v2133_v5 }
  0x5b   : > { %4183 = vst [vmem:[#allocation24_spill] sm:$0xff] %v2155_v15  ;;  %4184 = vst [vmem:[#allocation25_spill] sm:$0xff] %v2158_v16  ;;  %v2167_v21 = vld [vmem:[%s2107_s8 + $0x68] sm:$0xff]  ;;  %v2170_v22 = vld [vmem:[%s2107_s8 + $0x70] sm:$0xff]  ;;  %v325_v48 = vand.u32 2147483647, %v2136_v6 }
  0x5c   : > { %4185 = vst [vmem:[#allocation26_spill] sm:$0xff] %v2164_v20  ;;  %4186 = vst [vmem:[#allocation27_spill] sm:$0xff] %v2167_v21  ;;  %v2176_v26 = vld [vmem:[%s2107_s8 + $0x78] sm:$0xff]  ;;  %v2179_v27 = vld [vmem:[%s2107_s8 + $0x80] sm:$0xff]  ;;  %v326_v43 = vand.u32 2147483647, %v2140_v8 }
  0x5d   : > { %4187 = vst [vmem:[#allocation28_spill] sm:$0xff] %v2170_v22  ;;  %4188 = vst [vmem:[#allocation29_spill] sm:$0xff] %v2176_v26  ;;  %v2182_v28 = vld [vmem:[%s2107_s8 + $0x88] sm:$0xff]  ;;  %v2188_v32 = vld [vmem:[%s2107_s8 + $0x90] sm:$0xff]  ;;  %v327_v42 = vand.u32 2147483647, %v2143_v9 }
  0x5e   : > { %4189 = vst [vmem:[#allocation30_spill] sm:$0xff] %v2179_v27  ;;  %4190 = vst [vmem:[#allocation31_spill] sm:$0xff] %v2182_v28  ;;  %v2191_v33 = vld [vmem:[%s2107_s8 + $0x98] sm:$0xff]  ;;  %v2194_v34 = vld [vmem:[%s2107_s8 + $0xa0] sm:$0xff]  ;;  %v352_v36 = vsub.f32 0.0, %v320_v62  ;;  %v353_v35 = vsub.f32 0.0, %v321_v0 }
  0x5f   : > { %4191 = vst [vmem:[#allocation32_spill] sm:$0xff] %v2188_v32  ;;  %4192 = vst [vmem:[#allocation33_spill] sm:$0xff] %v2191_v33  ;;  %v2200_v38 = vld [vmem:[%s2107_s8 + $0xa8] sm:$0xff]  ;;  %v2203_v39 = vld [vmem:[%s2107_s8 + $0xb0] sm:$0xff]  ;;  %v354_v31 = vsub.f32 0.0, %v322_v55  ;;  %v355_v30 = vsub.f32 0.0, %v323_v54 }
  0x60   : > { %4193 = vst [vmem:[#allocation34_spill] sm:$0xff] %v2194_v34  ;;  %4194 = vst [vmem:[#allocation35_spill] sm:$0xff] %v2200_v38  ;;  %v2206_v40 = vld [vmem:[%s2107_s8 + $0xb8] sm:$0xff]  ;;  %v2212_v44 = vld [vmem:[%s2107_s8 + $0xc0] sm:$0xff]  ;;  %v328_v61 = vand.u32 2147483647, %v2146_v10 }
  0x61   : > { %4195 = vst [vmem:[#allocation36_spill] sm:$0xff] %v2203_v39  ;;  %4196 = vst [vmem:[#allocation37_spill] sm:$0xff] %v2206_v40  ;;  %v2215_v45 = vld [vmem:[%s2107_s8 + $0xc8] sm:$0xff]  ;;  %v2218_v46 = vld [vmem:[%s2107_s8 + $0xd0] sm:$0xff]  ;;  %v329_v47 = vand.u32 2147483647, %v2152_v14 }
  0x62   : > { %4197 = vst [vmem:[#allocation38_spill] sm:$0xff] %v2212_v44  ;;  %4198 = vst [vmem:[#allocation39_spill] sm:$0xff] %v2215_v45  ;;  %v2224_v50 = vld [vmem:[%s2107_s8 + $0xd8] sm:$0xff]  ;;  %v2227_v51 = vld [vmem:[%s2107_s8 + $0xe0] sm:$0xff]  ;;  %v356_v29 = vsub.f32 0.0, %v324_v49  ;;  %v357_v25 = vsub.f32 0.0, %v325_v48 }
  0x63   : > { %4199 = vst [vmem:[#allocation40_spill] sm:$0xff] %v2218_v46  ;;  %4200 = vst [vmem:[#allocation41_spill] sm:$0xff] %v2224_v50  ;;  %v2234_v56 = vld [vmem:[%s2107_s8 + $0xe8] sm:$0xff]  ;;  %v2237_v57 = vld [vmem:[%s2107_s8 + $0xf0] sm:$0xff]  ;;  %v330_v24 = vand.u32 2147483647, %v2155_v15 }
  0x64   : > { %4201 = vst [vmem:[#allocation42_spill] sm:$0xff] %v2227_v51  ;;  %4202 = vst [vmem:[#allocation43_spill] sm:$0xff] %v2234_v56  ;;  %v2240_v58 = vld [vmem:[%s2113_s29] sm:$0xff]  ;;  %v2243_v59 = vld [vmem:[%s2113_s29 + $0x8] sm:$0xff]  ;;  %v331_v41 = vand.u32 2147483647, %v2158_v16 }
  0x65   : > { %4203 = vst [vmem:[#allocation44_spill] sm:$0xff] %v2237_v57  ;;  %4204 = vst [vmem:[#allocation45_spill] sm:$0xff] %v2240_v58  ;;  %v2246_v60 = vld [vmem:[%s2113_s29 + $0x10] sm:$0xff]  ;;  %v2251_v63 = vld [vmem:[%s2107_s8 + $0xf8] sm:$0xff]  ;;  %v358_v23 = vsub.f32 0.0, %v326_v43  ;;  %v359_v37 = vsub.f32 0.0, %v327_v42 }
  0x66   : > { %4205 = vst [vmem:[#allocation46_spill] sm:$0xff] %v2243_v59  ;;  %4206 = vst [vmem:[#allocation47_spill] sm:$0xff] %v2246_v60  ;;  %v332_v53 = vand.u32 2147483647, %v2164_v20  ;;  %v333_v52 = vand.u32 2147483647, %v2167_v21 }
  0x67   : > { %4207 = vst [vmem:[#allocation48_spill] sm:$0xff] %v2251_v63  ;;  %v334_v62 = vand.u32 2147483647, %v2170_v22  ;;  %v335_v54 = vand.u32 2147483647, %v2176_v26  ;;  %v360_v58 = vsub.f32 0.0, %v328_v61 }
  0x68   : > { %v336_v55 = vand.u32 2147483647, %v2179_v27  ;;  %v337_v0 = vand.u32 2147483647, %v2182_v28  ;;  %v338_v48 = vand.u32 2147483647, %v2188_v32 }
  0x69   : > { %v339_v49 = vand.u32 2147483647, %v2191_v33  ;;  %v384_v19 = vmul.f32 1.442695, %v352_v36  ;;  %v340_v43 = vand.u32 2147483647, %v2194_v34 }
  0x6a   : > { %v341_v42 = vand.u32 2147483647, %v2200_v38  ;;  %v386_v18 = vmul.f32 1.442695, %v353_v35  ;;  %v342_v17 = vand.u32 2147483647, %v2203_v39 }
  0x6b   : > { %v343_v13 = vand.u32 2147483647, %v2206_v40  ;;  %v388_v12 = vmul.f32 1.442695, %v354_v31  ;;  %v344_v11 = vand.u32 2147483647, %v2212_v44  ;;  %1534 = vpow2.f32 %v384_v19 }
  0x6c   : > { %v345_v7 = vand.u32 2147483647, %v2215_v45  ;;  %v390_v60 = vmul.f32 1.442695, %v355_v30  ;;  %v346_v59 = vand.u32 2147483647, %v2218_v46  ;;  %1536 = vpow2.f32 %v386_v18 }
  0x6d   : > { %v392_v36 = vmul.f32 1.442695, %v356_v29  ;;  %v347_v34 = vand.u32 2147483647, %v2224_v50  ;;  %v361_v33 = vsub.f32 0.0, %v329_v47  ;;  %v362_v38 = vsub.f32 0.0, %v330_v24 }
  0x6e   : > { %v394_v35 = vmul.f32 1.442695, %v357_v25  ;;  %v348_v39 = vand.u32 2147483647, %v2227_v51  ;;  %1538 = vpow2.f32 %v388_v12  ;;  %v396_v31 = vmul.f32 1.442695, %v358_v23 }
  0x6f   : > { %v349_v44 = vand.u32 2147483647, %v2234_v56  ;;  %v363_v40 = vsub.f32 0.0, %v331_v41  ;;  %1540 = vpow2.f32 %v390_v60  ;;  %v398_v30 = vmul.f32 1.442695, %v359_v37  ;;  %s1357_s25 = sshll.u32 %s1947_s21, 4  ;;  %s1358_s25 = int_to_ptr.vmem [resolvable:$true] %s1357_s25 }
  0x70   : > { %v350_v46 = vand.u32 2147483647, %v2237_v57  ;;  %v364_v61 = vsub.f32 0.0, %v332_v53  ;;  %1542 = vpow2.f32 %v392_v36  ;;  %v400_v19 = vmul.f32 1.442695, %v360_v58  ;;  %s1846_s26 = scalar_lea.vmem %s1358_s25, 128  ;;  %p1853_p10 = scmp.lt.s32.totalorder %s1358_s25, %s1358_s25 }
  0x71   : > { %v351_v29 = vand.u32 2147483647, %v2251_v63  ;;  %v365_v47 = vsub.f32 0.0, %v333_v52  ;;  %1544 = vpow2.f32 %v394_v35  ;;  %v402_v18 = vmul.f32 1.442695, %v361_v33  ;;  %p1847_p1 = scmp.ne.s32.totalorder %s1358_s25, %s1846_s26  ;;  %p1854_p12 = scmp.lt.s32.totalorder %s1846_s26, %s1846_s26 }
  0x72   : > { %v366_v25 = vsub.f32 0.0, %v334_v62  ;;  %v367_v51 = vsub.f32 0.0, %v335_v54  ;;  %1546 = vpow2.f32 %v396_v31  ;;  %v404_v12 = vmul.f32 1.442695, %v362_v38 }
  0x73   : > { %v368_v23 = vsub.f32 0.0, %v336_v55  ;;  %v369_v24 = vsub.f32 0.0, %v337_v0  ;;  %1548 = vpow2.f32 %v398_v30  ;;  %v406_v41 = vmul.f32 1.442695, %v363_v40  ;;  %p1848_p4 = pnand %p1847_p1, %p1493_p11  ;;  %p1855_p0 = por %p1854_p12, %p1853_p10 }
  0x74   : > { %v370_v60 = vsub.f32 0.0, %v338_v48  ;;  %v371_v37 = vsub.f32 0.0, %v339_v49  ;;  %1550 = vpow2.f32 %v400_v19  ;;  %v408_v57 = vmul.f32 1.442695, %v364_v61  ;;  %v2316_v19 = vld [vmem:[%s2113_s29 + $0x40] sm:$0xff] }
  0x75   : > { %v372_v53 = vsub.f32 0.0, %v340_v43  ;;  %v373_v36 = vsub.f32 0.0, %v341_v42  ;;  %1552 = vpow2.f32 %v402_v18  ;;  %v410_v58 = vmul.f32 1.442695, %v365_v47  ;;  %v2305_v42 = vld [vmem:[%s2113_s29 + $0x28] sm:$0xff]  ;;  %4213 = vst [vmem:[#allocation54_spill] sm:$0xff] %v2316_v19  ;;  %p1849_p6 = pneg %p1848_p4 }
  0x76   : > { %v374_v63 = vsub.f32 0.0, %v342_v17  ;;  %v375_v52 = vsub.f32 0.0, %v343_v13  ;;  %1554 = vpow2.f32 %v404_v12  ;;  %v412_v33 = vmul.f32 1.442695, %v366_v25  ;;  %4210 = vst [vmem:[#allocation51_spill] sm:$0xff] %v2305_v42  ;;  %v2324_v12 = vld [vmem:[%s2113_s29 + $0x50] sm:$0xff] }
  0x77   : > { %v376_v62 = vsub.f32 0.0, %v344_v11  ;;  %v377_v38 = vsub.f32 0.0, %v345_v7  ;;  %1556 = vpow2.f32 %v406_v41  ;;  %v414_v54 = vmul.f32 1.442695, %v367_v51  ;;  %v2297_v11 = vld [vmem:[%s2113_s29 + $0x18] sm:$0xff]  ;;  %v2300_v7 = vld [vmem:[%s2113_s29 + $0x20] sm:$0xff]  ;;  %p1856_p9 = pnand %p1855_p0, %p1849_p6 }
  0x78   : > { %v378_v55 = vsub.f32 0.0, %v346_v59  ;;  %v379_v40 = vsub.f32 0.0, %v347_v34  ;;  %1558 = vpow2.f32 %v408_v57  ;;  %v416_v0 = vmul.f32 1.442695, %v368_v23  ;;  %v2292_v48 = vpop.eup %1534  ;;  %4208 = vst [vmem:[#allocation49_spill] sm:$0xff] %v2297_v11  ;;  %4209 = vst [vmem:[#allocation50_spill] sm:$0xff] %v2300_v7 }
  0x79   : > { %v380_v49 = vsub.f32 0.0, %v348_v39  ;;  %v381_v17 = vsub.f32 0.0, %v349_v44  ;;  %1560 = vpow2.f32 %v410_v58  ;;  %v418_v13 = vmul.f32 1.442695, %v369_v24  ;;  %v2294_v43 = vpop.eup %1536  ;;  %v2308_v39 = vld [vmem:[%s2113_s29 + $0x30] sm:$0xff]  ;;  %v2311_v44 = vld [vmem:[%s2113_s29 + $0x38] sm:$0xff] }
  0x7a   : > { %v382_v34 = vsub.f32 0.0, %v350_v46  ;;  %v383_v51 = vsub.f32 0.0, %v351_v29  ;;  %1562 = vpow2.f32 %v412_v33  ;;  %v420_v57 = vmul.f32 1.442695, %v370_v60  ;;  %4211 = vst [vmem:[#allocation52_spill] sm:$0xff] %v2308_v39  ;;  %4212 = vst [vmem:[#allocation53_spill] sm:$0xff] %v2311_v44 }
  0x7b   : > { %v2302_v59 = vpop.eup %1538  ;;  %1564 = vpow2.f32 %v414_v54  ;;  %v422_v35 = vmul.f32 1.442695, %v371_v37  ;;  %v424_v31 = vmul.f32 1.442695, %v372_v53  ;;  %v426_v30 = vmul.f32 1.442695, %v373_v36 }
  0x7c   : > { %v2313_v61 = vpop.eup %1540  ;;  %v2319_v46 = vld [vmem:[%s2113_s29 + $0x48] sm:$0xff]  ;;  %1566 = vpow2.f32 %v416_v0  ;;  %v428_v29 = vmul.f32 1.442695, %v374_v63  ;;  %v430_v47 = vmul.f32 1.442695, %v375_v52  ;;  %4215 = vst [vmem:[#allocation56_spill] sm:$0xff] %v2324_v12 }
  0x7d   : > { %4214 = vst [vmem:[#allocation55_spill] sm:$0xff] %v2319_v46  ;;  %v432_v18 = vmul.f32 1.442695, %v376_v62  ;;  %v2321_v25 = vpop.eup %1542  ;;  %1568 = vpow2.f32 %v418_v13  ;;  %v434_v23 = vmul.f32 1.442695, %v377_v38  ;;  %v2333_v58 = vld [vmem:[%s2113_s29 + $0x58] sm:$0xff] }
  0x7e   : > { %v436_v24 = vmul.f32 1.442695, %v378_v55  ;;  %v438_v41 = vmul.f32 1.442695, %v379_v40  ;;  %v2326_v60 = vpop.eup %1544  ;;  %1570 = vpow2.f32 %v420_v57  ;;  %v440_v37 = vmul.f32 1.442695, %v380_v49 }
  0x7f   : > { %v442_v53 = vmul.f32 1.442695, %v381_v17  ;;  %v2328_v36 = vmul.f32 1.442695, %v382_v34  ;;  %v2330_v63 = vpop.eup %1546  ;;  %4216 = vst [vmem:[#allocation57_spill] sm:$0xff] %v2333_v58  ;;  %v2336_v52 = vld [vmem:[%s2113_s29 + $0x60] sm:$0xff]  ;;  %1572 = vpow2.f32 %v422_v35 }
  0x80   : > { %4217 = vst [vmem:[#allocation58_spill] sm:$0xff] %v2336_v52  ;;  %v2338_v33 = vmul.f32 1.442695, %v383_v51  ;;  %v2342_v54 = vpop.eup %1548  ;;  %v2345_v55 = vld [vmem:[%s2113_s29 + $0x68] sm:$0xff]  ;;  %v2348_v40 = vld [vmem:[%s2113_s29 + $0x70] sm:$0xff]  ;;  %1574 = vpow2.f32 %v424_v31  ;;  %v2356_v34 = vld [vmem:[%s2113_s29 + $0x78] sm:$0xff] }
  0x81   : > { %4218 = vst [vmem:[#allocation59_spill] sm:$0xff] %v2345_v55  ;;  %4219 = vst [vmem:[#allocation60_spill] sm:$0xff] %v2348_v40  ;;  %v2353_v13 = vpop.eup %1550  ;;  %v2359_v51 = vld [vmem:[%s2113_s29 + $0x80] sm:$0xff]  ;;  %1576 = vpow2.f32 %v426_v30  ;;  %v451_v57 = vmul.f32 -0.5, %v2292_v48  ;;  %v2367_v0 = vld [vmem:[%s2113_s29 + $0x88] sm:$0xff]  ;;  %v460_v35 = vmul.f32 -0.5, %v2294_v43 }
  0x82   : > { %4220 = vst [vmem:[#allocation61_spill] sm:$0xff] %v2356_v34  ;;  %4221 = vst [vmem:[#allocation62_spill] sm:$0xff] %v2359_v51  ;;  %v2364_v38 = vpop.eup %1552  ;;  %1578 = vpow2.f32 %v428_v29  ;;  %v2375_v30 = vld [vmem:[%s2113_s29 + $0x90] sm:$0xff]  ;;  %v469_v29 = vmul.f32 -0.5, %v2302_v59  ;;  %v448_v46 = vadd.f32 1.0, %v2292_v48  ;;  %v457_v62 = vadd.f32 1.0, %v2294_v43 }
  0x83   : > { %4222 = vst [vmem:[#allocation63_spill] sm:$0xff] %v2367_v0  ;;  %v2372_v44 = vpop.eup %1554  ;;  %4223 = vst [vmem:[#allocation64_spill] sm:$0xff] %v2375_v30  ;;  %1580 = vpow2.f32 %v430_v47  ;;  %v452_v52 = vadd.f32 1.0, %v451_v57  ;;  %v478_v47 = vmul.f32 -0.5, %v2313_v61  ;;  %v487_v57 = vmul.f32 -0.5, %v2321_v25 }
  0x84   : > { %v2380_v19 = vpop.eup %1556  ;;  %1582 = vpow2.f32 %v432_v18  ;;  %v496_v0 = vmul.f32 -0.5, %v2326_v60  ;;  %v475_v58 = vadd.f32 1.0, %v2313_v61  ;;  %v532_v56 = vmul.f32 -0.5, %v2364_v38 }
  0x85   : > { %v2385_v17 = vpop.eup %1558  ;;  %1584 = vpow2.f32 %v434_v23  ;;  %v461_v23 = vadd.f32 1.0, %v460_v35  ;;  %v2405_v40 = vmul.f32 %v2292_v48, %v452_v52  ;;  %v479_v18 = vadd.f32 1.0, %v478_v47 }
  0x86   : > { %v2389_v31 = vpop.eup %1560  ;;  %1586 = vpow2.f32 %v436_v24  ;;  %v470_v24 = vadd.f32 1.0, %v469_v29  ;;  %v505_v29 = vmul.f32 -0.5, %v2330_v63  ;;  %v488_v47 = vadd.f32 1.0, %v487_v57 }
  0x87   : > { %v2394_v49 = vpop.eup %1562  ;;  %1588 = vpow2.f32 %v438_v41  ;;  %v466_v41 = vadd.f32 1.0, %v2302_v59  ;;  %v497_v12 = vadd.f32 1.0, %v496_v0  ;;  %v493_v52 = vadd.f32 1.0, %v2326_v60 }
  0x88   : > { %v2398_v51 = vpop.eup %1564  ;;  %1590 = vpow2.f32 %v440_v37  ;;  %v484_v37 = vadd.f32 1.0, %v2321_v25  ;;  %v506_v42 = vadd.f32 1.0, %v505_v29  ;;  %v511_v0 = vadd.f32 1.0, %v2342_v54 }
  0x89   : > { %v2402_v34 = vpop.eup %1566  ;;  %1592 = vpow2.f32 %v442_v53  ;;  %v2418_v53 = vmul.f32 %v2294_v43, %v461_v23  ;;  %v520_v29 = vadd.f32 1.0, %v2353_v13  ;;  %v538_v45 = vadd.f32 1.0, %v2372_v44 }
  0x8a   : > { %v2408_v35 = vpop.eup %1568  ;;  %1594 = vpow2.f32 %v2328_v36  ;;  %v2424_v36 = vmul.f32 %v2302_v59, %v470_v24  ;;  %v502_v24 = vadd.f32 1.0, %v2330_v63  ;;  %v541_v28 = vmul.f32 -0.5, %v2372_v44 }
  0x8b   : > { %v2414_v30 = vpop.eup %1570  ;;  %1596 = vpow2.f32 %v2338_v33  ;;  %v2430_v33 = vmul.f32 %v2313_v61, %v479_v18  ;;  %v514_v18 = vmul.f32 -0.5, %v2342_v54  ;;  %v547_v27 = vadd.f32 1.0, %v2380_v19 }
  0x8c   : > { %v2421_v55 = vpop.eup %1572  ;;  %1598 = vlog2.f32 %v448_v46  ;;  %v508_v46 = vand.u32 2147483647, %v2330_v63  ;;  %v533_v20 = vadd.f32 1.0, %v532_v56  ;;  %v4230_v16 = vand.u32 2147483647, %v2292_v48 }
  0x8d   : > { %v2427_v39 = vpop.eup %1574  ;;  %1600 = vlog2.f32 %v457_v62  ;;  %4224 = vst [vmem:[#allocation65_spill] sm:$0xff] %v2430_v33  ;;  %v2441_v62 = vmul.f32 %v2321_v25, %v488_v47  ;;  %v529_v47 = vadd.f32 1.0, %v2364_v38  ;;  %v4231_v15 = vmov 0 }
  0x8e   : > { %v2434_v57 = vpop.eup %1576  ;;  %1602 = vlog2.f32 %v466_v41  ;;  %v2448_v41 = vmul.f32 %v2326_v60, %v497_v12  ;;  %v517_v12 = vand.u32 2147483647, %v2342_v54  ;;  %vm2480_vm0 = vcmp.lt.f32.partialorder %v4230_v16, 0.0004427343 }
  0x8f   : > { %v2438_v7 = vpop.eup %1578  ;;  %1604 = vlog2.f32 %v475_v58  ;;  %v523_v58 = vmul.f32 -0.5, %v2353_v13  ;;  %v4232_v15 = vsel %vm2480_vm0, 4294967295, %v4231_v15  ;;  %v568_v14 = vmul.f32 -0.5, %v2389_v31 }
  0x90   : > { %v2445_v23 = vpop.eup %1580  ;;  %1606 = vlog2.f32 %v484_v37  ;;  %v2460_v37 = vmul.f32 %v2330_v63, %v506_v42  ;;  %v550_v42 = vmul.f32 -0.5, %v2380_v19  ;;  %v556_v63 = vadd.f32 1.0, %v2385_v17  ;;  %4233 = vst [vmem:[#allocation71_spill] sm:$0xff] %v4232_v15 }
  0x91   : > { %v2452_v11 = vpop.eup %1582  ;;  %1608 = vlog2.f32 %v493_v52  ;;  %v515_v52 = vadd.f32 1.0, %v514_v18  ;;  %v524_v21 = vadd.f32 1.0, %v523_v58  ;;  %v574_v10 = vadd.f32 1.0, %v2394_v49 }
  0x92   : > { %v2457_v50 = vpop.eup %1584  ;;  %1610 = vlog2.f32 %v502_v24  ;;  %v526_v24 = vand.u32 2147483647, %v2353_v13  ;;  %v542_v9 = vadd.f32 1.0, %v541_v28  ;;  %v4236_v48 = vand.u32 2147483647, %v2294_v43  ;;  %v4367_v28 = vld [vmem:[#allocation19_spill] sm:$0xff] }
  0x93   : > { %4225 = vst [vmem:[#allocation66_spill] sm:$0xff] %v2457_v50  ;;  %v2464_v32 = vpop.eup %1586  ;;  %1612 = vlog2.f32 %v511_v0  ;;  %v565_v0 = vadd.f32 1.0, %v2389_v31  ;;  %v2490_v56 = vmul.f32 %v2342_v54, %v515_v52  ;;  %v551_v8 = vadd.f32 1.0, %v550_v42 }
  0x94   : > { %4226 = vst [vmem:[#allocation67_spill] sm:$0xff] %v2464_v32  ;;  %v2468_v26 = vpop.eup %1588  ;;  %1614 = vlog2.f32 %v520_v29  ;;  %v559_v29 = vmul.f32 -0.5, %v2385_v17  ;;  %vm2497_vm1 = vcmp.lt.f32.partialorder %v4236_v48, 0.0004427343  ;;  %v577_v6 = vmul.f32 -0.5, %v2394_v49 }
  0x95   : > { %4227 = vst [vmem:[#allocation68_spill] sm:$0xff] %v2468_v26  ;;  %v2473_v22 = vpop.eup %1590  ;;  %1616 = vlog2.f32 %v529_v47  ;;  %v535_v47 = vand.u32 2147483647, %v2364_v38  ;;  %v583_v5 = vadd.f32 1.0, %v2398_v51  ;;  %v4239_v52 = vand.u32 2147483647, %v2302_v59 }
  0x96   : > { %4228 = vst [vmem:[#allocation69_spill] sm:$0xff] %v2473_v22  ;;  %v2476_v18 = vpop.eup %1592  ;;  %1618 = vlog2.f32 %v538_v45  ;;  %v544_v43 = vand.u32 2147483647, %v2372_v44  ;;  %v586_v42 = vmul.f32 -0.5, %v2398_v51  ;;  %v4242_v48 = vand.u32 2147483647, %v2313_v61 }
  0x97   : > { %4229 = vst [vmem:[#allocation70_spill] sm:$0xff] %v2476_v18  ;;  %v2487_v58 = vpop.eup %1594  ;;  %1620 = vlog2.f32 %v547_v27  ;;  %vm2505_vm2 = vcmp.lt.f32.partialorder %v4239_v52, 0.0004427343  ;;  %v2510_v27 = vmul.f32 %v2353_v13, %v524_v21  ;;  %v4243_v4 = vmov 0 }
  0x98   : > { %4234 = vst [vmem:[#allocation72_spill] sm:$0xff] %v2487_v58  ;;  %v2493_v16 = vpop.eup %1596  ;;  %1622 = vlog2.f32 %v556_v63  ;;  %vm2516_vm3 = vcmp.lt.f32.partialorder %v4242_v48, 0.0004427343  ;;  %v2521_v59 = vmul.f32 %v2364_v38, %v533_v20  ;;  %v560_v52 = vadd.f32 1.0, %v559_v29 }
  0x99   : > { %4235 = vst [vmem:[#allocation73_spill] sm:$0xff] %v2493_v16  ;;  %v1599_v54 = vpop.eup %1598  ;;  %1624 = vlog2.f32 %v565_v0  ;;  %v4244_v4 = vsel %vm2516_vm3, 4294967295, %v4243_v4  ;;  %v569_v3 = vadd.f32 1.0, %v568_v14  ;;  %v4246_v13 = vand.u32 2147483647, %v2321_v25 }
  0x9a   : > { %v1601_v63 = vpop.eup %1600  ;;  %4245 = vst [vmem:[#allocation74_spill] sm:$0xff] %v4244_v4  ;;  %1626 = vlog2.f32 %v574_v10  ;;  %v4249_v2 = vand.u32 2147483647, %v2326_v60  ;;  %v4250_v61 = vmov 0  ;;  %vm2535_vm6 = vcmp.lt.f32.partialorder %v508_v46, 0.0004427343 }
  0x9b   : > { %v1603_v21 = vpop.eup %1602  ;;  %vm2525_vm4 = vcmp.lt.f32.partialorder %v4246_v13, 0.0004427343  ;;  %v2540_v14 = vmul.f32 %v2372_v44, %v542_v9  ;;  %v553_v10 = vand.u32 2147483647, %v2380_v19  ;;  %v592_v20 = vadd.f32 1.0, %v2402_v34 }
  0x9c   : > { %vm2531_vm5 = vcmp.lt.f32.partialorder %v4249_v2, 0.0004427343  ;;  %v595_v25 = vmul.f32 -0.5, %v2402_v34  ;;  %v1605_v38 = vpop.eup %1604  ;;  %v2546_v60 = vmul.f32 %v2380_v19, %v551_v8  ;;  %v562_v2 = vand.u32 2147483647, %v2385_v17 }
  0x9d   : > { %v4251_v61 = vsel %vm2531_vm5, 4294967295, %v4250_v61  ;;  %4254 = vst [vmem:[#allocation75_spill] sm:$0xff] %v2540_v14  ;;  %v578_v29 = vadd.f32 1.0, %v577_v6  ;;  %1628 = vlog2.f32 %v583_v5  ;;  %v1607_v46 = vpop.eup %1606  ;;  %v2549_v13 = vmul.f32 0.6931472, %v1599_v54 }
  0x9e   : > { %vm2551_vm7 = vcmp.lt.f32.partialorder %v517_v12, 0.0004427343  ;;  %v4255_v9 = vmov 0  ;;  %v571_v44 = vand.u32 2147483647, %v2389_v31  ;;  %v587_v1 = vadd.f32 1.0, %v586_v42  ;;  %v1609_v58 = vpop.eup %1608 }
  0x9f   : > { %v4256_v9 = vsel %vm2551_vm7, 4294967295, %v4255_v9  ;;  %v601_v16 = vadd.f32 1.0, %v2408_v35  ;;  %vm2557_vm8 = vcmp.lt.f32.partialorder %v526_v24, 0.0004427343  ;;  %v4257_v8 = vmov 0  ;;  %v1611_v42 = vpop.eup %1610 }
  0xa0   : > { %v4258_v8 = vsel %vm2557_vm8, 4294967295, %v4257_v8  ;;  %vm2561_vm9 = vcmp.lt.f32.partialorder %v535_v47, 0.0004427343  ;;  %v4260_v6 = vmov 0  ;;  %v2566_v5 = vmul.f32 %v2385_v17, %v560_v52  ;;  %v1613_v22 = vpop.eup %1612 }
  0xa1   : > { %4259 = vst [vmem:[#allocation76_spill] sm:$0xff] %v4258_v8  ;;  %v4261_v6 = vsel %vm2561_vm9, 4294967295, %v4260_v6  ;;  %v2569_v19 = vmul.f32 %v2389_v31, %v569_v3  ;;  %v580_v12 = vand.u32 2147483647, %v2394_v49  ;;  %v610_v54 = vadd.f32 1.0, %v2414_v30 }
  0xa2   : > { %4262 = vst [vmem:[#allocation77_spill] sm:$0xff] %v2566_v5  ;;  %v2573_v18 = vmul.f32 0.6931472, %v1601_v63  ;;  %v589_v24 = vand.u32 2147483647, %v2398_v51  ;;  %1630 = vlog2.f32 %v592_v20  ;;  %v596_v47 = vadd.f32 1.0, %v595_v25  ;;  %v1615_v63 = vpop.eup %1614 }
  0xa3   : > { %4263 = vst [vmem:[#allocation78_spill] sm:$0xff] %v2569_v19  ;;  %v2576_v26 = vmul.f32 0.6931472, %v1603_v21  ;;  %vm2578_vm10 = vcmp.lt.f32.partialorder %v544_v43, 0.0004427343  ;;  %v4265_v17 = vmov 0  ;;  %v2583_v3 = vmul.f32 %v2394_v49, %v578_v29  ;;  %v1617_v49 = vpop.eup %1616 }
  0xa4   : > { %4264 = vst [vmem:[#allocation79_spill] sm:$0xff] %v2573_v18  ;;  %v4266_v17 = vsel %vm2578_vm10, 4294967295, %v4265_v17  ;;  %v598_v31 = vand.u32 2147483647, %v2402_v34  ;;  %v604_v52 = vmul.f32 -0.5, %v2408_v35  ;;  %v4270_v43 = vmov 0 }
  0xa5   : > { %4267 = vst [vmem:[#allocation80_spill] sm:$0xff] %v4266_v17  ;;  %4268 = vst [vmem:[#allocation81_spill] sm:$0xff] %v2583_v3  ;;  %v2591_v25 = vmul.f32 0.6931472, %v1605_v38  ;;  %vm2593_vm11 = vcmp.lt.f32.partialorder %v553_v10, 0.0004427343  ;;  %v2598_v21 = vmul.f32 %v2398_v51, %v587_v1  ;;  %1632 = vlog2.f32 %v601_v16  ;;  %v1619_v10 = vpop.eup %1618 }
  0xa6   : > { %v4271_v43 = vsel %vm2593_vm11, 4294967295, %v4270_v43  ;;  %v2600_v29 = vmul.f32 0.6931472, %v1607_v46  ;;  %v2602_v32 = vmul.f32 0.6931472, %v1609_v58  ;;  %v4274_v15 = vmov 0  ;;  %v1621_v46 = vpop.eup %1620 }
  0xa7   : > { %4269 = vst [vmem:[#allocation82_spill] sm:$0xff] %v2591_v25  ;;  %4272 = vst [vmem:[#allocation83_spill] sm:$0xff] %v2598_v21  ;;  %v2604_v50 = vmul.f32 0.6931472, %v1611_v42  ;;  %vm2606_vm12 = vcmp.lt.f32.partialorder %v562_v2, 0.0004427343  ;;  %1634 = vlog2.f32 %v610_v54  ;;  %v2623_v16 = vmul.f32 %v2402_v34, %v596_v47  ;;  %v1623_v1 = vpop.eup %1622 }
  0xa8   : > { %4273 = vst [vmem:[#allocation84_spill] sm:$0xff] %v2602_v32  ;;  %v4275_v15 = vsel %vm2606_vm12, 4294967295, %v4274_v15  ;;  %vm2614_vm13 = vcmp.lt.f32.partialorder %v571_v44, 0.0004427343  ;;  %v4277_v51 = vmov 0  ;;  %v4280_v58 = vmov 0  ;;  %v1625_v44 = vpop.eup %1624 }
  0xa9   : > { %4276 = vst [vmem:[#allocation85_spill] sm:$0xff] %v4275_v15  ;;  %v4278_v51 = vsel %vm2614_vm13, 4294967295, %v4277_v51  ;;  %vm2618_vm14 = vcmp.lt.f32.partialorder %v580_v12, 0.0004427343  ;;  %4283 = vst [vmem:[#allocation88_spill] sm:$0xff] %v2623_v16  ;;  %v613_v38 = vmul.f32 -0.5, %v2414_v30  ;;  %v1627_v34 = vpop.eup %1626  ;;  %v4374_v0 = vsel %vm2535_vm6, %v2460_v37, %v2604_v50 }
  0xaa   : > { %4279 = vst [vmem:[#allocation86_spill] sm:$0xff] %v4278_v51  ;;  %v4281_v58 = vsel %vm2618_vm14, 4294967295, %v4280_v58  ;;  %v619_v2 = vadd.f32 1.0, %v2421_v55  ;;  %v2631_v54 = vmul.f32 0.6931472, %v1613_v22  ;;  %v605_v42 = vadd.f32 1.0, %v604_v52 }
  0xab   : > { %4282 = vst [vmem:[#allocation87_spill] sm:$0xff] %v4281_v58  ;;  %v607_v12 = vand.u32 2147483647, %v2408_v35  ;;  %v2638_v47 = vmul.f32 0.6931472, %v1615_v63  ;;  %v4285_v18 = vmov 0 }
  0xac   : > { %4284 = vst [vmem:[#allocation89_spill] sm:$0xff] %v2631_v54  ;;  %v2640_v20 = vmul.f32 0.6931472, %v1617_v49  ;;  %vm2642_vm15 = vcmp.lt.f32.partialorder %v589_v24, 0.0004427343  ;;  %v622_v22 = vmul.f32 -0.5, %v2421_v55  ;;  %1636 = vlog2.f32 %v619_v2 }
  0xad   : > { %v4286_v18 = vsel %vm2642_vm15, 4294967295, %v4285_v18  ;;  %v628_v49 = vadd.f32 1.0, %v2427_v39  ;;  %v2660_v25 = vmul.f32 0.6931472, %v1619_v10  ;;  %v614_v33 = vadd.f32 1.0, %v613_v38  ;;  %v1629_v38 = vpop.eup %1628 }
  0xae   : > { %4287 = vst [vmem:[#allocation90_spill] sm:$0xff] %v4286_v18  ;;  %v616_v4 = vand.u32 2147483647, %v2414_v30  ;;  %v2667_v63 = vmul.f32 0.6931472, %v1621_v46  ;;  %v4290_v32 = vmov 0  ;;  %v2674_v24 = vmul.f32 %v2408_v35, %v605_v42 }
  0xaf   : > { %4288 = vst [vmem:[#allocation91_spill] sm:$0xff] %v2660_v25  ;;  %vm2669_vm5 = vcmp.lt.f32.partialorder %v598_v31, 0.0004427343  ;;  %v631_v10 = vmul.f32 -0.5, %v2427_v39  ;;  %v2685_v31 = vmul.f32 0.6931472, %v1623_v1  ;;  %1638 = vlog2.f32 %v628_v49 }
  0xb0   : > { %4289 = vst [vmem:[#allocation92_spill] sm:$0xff] %v2667_v63  ;;  %v4291_v32 = vsel %vm2669_vm5, 4294967295, %v4290_v32  ;;  %4293 = vst [vmem:[#allocation94_spill] sm:$0xff] %v2674_v24  ;;  %v623_v52 = vadd.f32 1.0, %v622_v22  ;;  %v2687_v54 = vmul.f32 0.6931472, %v1625_v44  ;;  %v2701_v1 = vmul.f32 %v2414_v30, %v614_v33  ;;  %v1631_v22 = vpop.eup %1630 }
  0xb1   : > { %4292 = vst [vmem:[#allocation93_spill] sm:$0xff] %v4291_v32  ;;  %4294 = vst [vmem:[#allocation95_spill] sm:$0xff] %v2685_v31  ;;  %v2689_v35 = vmul.f32 0.6931472, %v1627_v34  ;;  %vm2691_vm7 = vcmp.lt.f32.partialorder %v607_v12, 0.0004427343 }
  0xb2   : > { %4295 = vst [vmem:[#allocation96_spill] sm:$0xff] %v2687_v54  ;;  %v4297_v42 = vmov 0  ;;  %v637_v8 = vadd.f32 1.0, %v2434_v57  ;;  %4300 = vst [vmem:[#allocation99_spill] sm:$0xff] %v2701_v1  ;;  %vm2703_vm9 = vcmp.lt.f32.partialorder %v616_v4, 0.0004427343  ;;  %v2721_v33 = vmul.f32 %v2421_v55, %v623_v52  ;;  %v1633_v17 = vpop.eup %1632 }
  0xb3   : > { %4296 = vst [vmem:[#allocation97_spill] sm:$0xff] %v2689_v35  ;;  %v4298_v42 = vsel %vm2691_vm7, 4294967295, %v4297_v42  ;;  %v4301_v44 = vmov 0  ;;  %v625_v12 = vand.u32 2147483647, %v2421_v55  ;;  %v646_v34 = vadd.f32 1.0, %v2438_v7 }
  0xb4   : > { %4299 = vst [vmem:[#allocation98_spill] sm:$0xff] %v4298_v42  ;;  %v4302_v44 = vsel %vm2703_vm9, 4294967295, %v4301_v44  ;;  %v2713_v46 = vmul.f32 0.6931472, %v1629_v38  ;;  %v632_v2 = vadd.f32 1.0, %v631_v10  ;;  %v655_v30 = vadd.f32 1.0, %v2445_v23  ;;  %v1635_v55 = vpop.eup %1634 }
  0xb5   : > { %4303 = vst [vmem:[#allocation100_spill] sm:$0xff] %v4302_v44  ;;  %4305 = vst [vmem:[#allocation102_spill] sm:$0xff] %v2721_v33  ;;  %v640_v25 = vmul.f32 -0.5, %v2434_v57  ;;  %v664_v14 = vadd.f32 1.0, %v2452_v11  ;;  %1640 = vlog2.f32 %v637_v8  ;;  %v4306_v4 = vld [vmem:[#allocation66_spill] sm:$0xff]  ;;  %v649_v5 = vmul.f32 -0.5, %v2438_v7 }
  0xb6   : > { %4304 = vst [vmem:[#allocation101_spill] sm:$0xff] %v2713_v46  ;;  %v673_v49 = vadd.f32 1.0, %v4306_v4  ;;  %v2734_v52 = vmul.f32 0.6931472, %v1631_v22  ;;  %v634_v31 = vand.u32 2147483647, %v2427_v39  ;;  %1642 = vlog2.f32 %v646_v34 }
  0xb7   : > { %vm2742_vm13 = vcmp.lt.f32.partialorder %v625_v12, 0.0004427343  ;;  %v4308_v54 = vmov 0  ;;  %v2747_v8 = vmul.f32 %v2427_v39, %v632_v2  ;;  %1644 = vlog2.f32 %v655_v30  ;;  %v4312_v22 = vld [vmem:[#allocation67_spill] sm:$0xff]  ;;  %v4315_v12 = vld [vmem:[#allocation68_spill] sm:$0xff]  ;;  %v4478_v39 = vld [vmem:[#allocation37_spill] sm:$0xff] }
  0xb8   : > { %4307 = vst [vmem:[#allocation66_spill] sm:$0xff] %v2734_v52  ;;  %v4309_v54 = vsel %vm2742_vm13, 4294967295, %v4308_v54  ;;  %v682_v38 = vadd.f32 1.0, %v4312_v22  ;;  %v2750_v35 = vmul.f32 0.6931472, %v1633_v17  ;;  %v641_v34 = vadd.f32 1.0, %v640_v25 }
  0xb9   : > { %4310 = vst [vmem:[#allocation103_spill] sm:$0xff] %v4309_v54  ;;  %4311 = vst [vmem:[#allocation104_spill] sm:$0xff] %v2747_v8  ;;  %v643_v3 = vand.u32 2147483647, %v2434_v57  ;;  %1646 = vlog2.f32 %v664_v14  ;;  %v2753_v58 = vmul.f32 0.6931472, %v1635_v55  ;;  %v1637_v14 = vpop.eup %1636 }
  0xba   : > { %4313 = vst [vmem:[#allocation67_spill] sm:$0xff] %v2750_v35  ;;  %v658_v10 = vmul.f32 -0.5, %v2445_v23  ;;  %1648 = vlog2.f32 %v673_v49  ;;  %v691_v46 = vadd.f32 1.0, %v4315_v12  ;;  %vm2761_vm15 = vcmp.lt.f32.partialorder %v634_v31, 0.0004427343  ;;  %v4319_v49 = vld [vmem:[#allocation69_spill] sm:$0xff] }
  0xbb   : > { %4314 = vst [vmem:[#allocation105_spill] sm:$0xff] %v2753_v58  ;;  %v4316_v2 = vmov 0  ;;  %v650_v17 = vadd.f32 1.0, %v649_v5  ;;  %v667_v25 = vmul.f32 -0.5, %v2452_v11  ;;  %v652_v30 = vand.u32 2147483647, %v2438_v7 }
  0xbc   : > { %v4317_v2 = vsel %vm2761_vm15, 4294967295, %v4316_v2  ;;  %v676_v55 = vmul.f32 -0.5, %v4306_v4  ;;  %1650 = vlog2.f32 %v682_v38  ;;  %v700_v21 = vadd.f32 1.0, %v4319_v49  ;;  %v4320_v52 = vld [vmem:[#allocation70_spill] sm:$0xff]  ;;  %v1639_v19 = vpop.eup %1638  ;;  %v4324_v35 = vld [vmem:[#allocation72_spill] sm:$0xff]  ;;  %v4421_v37 = vld [vmem:[#allocation97_spill] sm:$0xff] }
  0xbd   : > { %4318 = vst [vmem:[#allocation68_spill] sm:$0xff] %v4317_v2  ;;  %v2774_v31 = vmul.f32 %v2434_v57, %v641_v34  ;;  %v661_v5 = vand.u32 2147483647, %v2445_v23  ;;  %v709_v16 = vadd.f32 1.0, %v4320_v52  ;;  %v659_v38 = vadd.f32 1.0, %v658_v10 }
  0xbe   : > { %v670_v18 = vand.u32 2147483647, %v2452_v11  ;;  %1652 = vlog2.f32 %v691_v46  ;;  %v2783_v51 = vmul.f32 0.6931472, %v1637_v14  ;;  %vm2785_vm7 = vcmp.lt.f32.partialorder %v643_v3, 0.0004427343 }
  0xbf   : > { %v2790_v57 = vmul.f32 %v2438_v7, %v650_v17  ;;  %v668_v34 = vadd.f32 1.0, %v667_v25  ;;  %v718_v24 = vadd.f32 1.0, %v4324_v35  ;;  %vm2793_vm5 = vcmp.lt.f32.partialorder %v652_v30, 0.0004427343  ;;  %v4329_v17 = vld [vmem:[#allocation73_spill] sm:$0xff] }
  0xc0   : > { %4321 = vst [vmem:[#allocation69_spill] sm:$0xff] %v2783_v51  ;;  %v677_v10 = vadd.f32 1.0, %v676_v55  ;;  %v679_v46 = vand.u32 2147483647, %v4306_v4  ;;  %v685_v14 = vmul.f32 -0.5, %v4312_v22  ;;  %1654 = vlog2.f32 %v700_v21 }
  0xc1   : > { %vm2799_vm9 = vcmp.lt.f32.partialorder %v661_v5, 0.0004427343  ;;  %v694_v7 = vmul.f32 -0.5, %v4315_v12  ;;  %1656 = vlog2.f32 %v709_v16  ;;  %v727_v25 = vadd.f32 1.0, %v4329_v17 }
  0xc2   : > { %v2805_v32 = vmul.f32 0.6931472, %v1639_v19  ;;  %v2808_v30 = vmul.f32 %v2445_v23, %v659_v38  ;;  %vm2810_vm14 = vcmp.lt.f32.partialorder %v670_v18, 0.0004427343  ;;  %v688_v21 = vand.u32 2147483647, %v4312_v22  ;;  %v1641_v5 = vpop.eup %1640 }
  0xc3   : > { %v2820_v16 = vmul.f32 %v2452_v11, %v668_v34  ;;  %v703_v19 = vmul.f32 -0.5, %v4319_v49  ;;  %1658 = vlog2.f32 %v718_v24  ;;  %v1643_v23 = vpop.eup %1642  ;;  %v2824_v18 = vmul.f32 %v4306_v4, %v677_v10  ;;  %v4361_v38 = vld [vmem:[#allocation65_spill] sm:$0xff] }
  0xc4   : > { %4330 = vst [vmem:[#allocation70_spill] sm:$0xff] %v2805_v32  ;;  %vm2826_vm12 = vcmp.lt.f32.partialorder %v679_v46, 0.0004427343  ;;  %v686_v1 = vadd.f32 1.0, %v685_v14  ;;  %v712_v42 = vmul.f32 -0.5, %v4320_v52  ;;  %v1645_v15 = vpop.eup %1644  ;;  %v695_v54 = vadd.f32 1.0, %v694_v7 }
  0xc5   : > { %v697_v58 = vand.u32 2147483647, %v4315_v12  ;;  %v721_v11 = vmul.f32 -0.5, %v4324_v35  ;;  %1660 = vlog2.f32 %v727_v25  ;;  %v2837_v4 = vmul.f32 0.6931472, %v1641_v5 }
  0xc6   : > { %v1647_v34 = vpop.eup %1646  ;;  %vm2839_vm13 = vcmp.lt.f32.partialorder %v688_v21, 0.0004427343  ;;  %v706_v46 = vand.u32 2147483647, %v4319_v49  ;;  %v2844_v7 = vmul.f32 0.6931472, %v1643_v23  ;;  %v2851_v24 = vmul.f32 %v4312_v22, %v686_v1 }
  0xc7   : > { %v1649_v14 = vpop.eup %1648  ;;  %v704_v51 = vadd.f32 1.0, %v703_v19  ;;  %v715_v25 = vand.u32 2147483647, %v4320_v52  ;;  %v730_v33 = vmul.f32 -0.5, %v4329_v17  ;;  %v2848_v63 = vmul.f32 0.6931472, %v1645_v15 }
  0xc8   : > { %v713_v5 = vadd.f32 1.0, %v712_v42  ;;  %v724_v21 = vand.u32 2147483647, %v4324_v35  ;;  %v2854_v8 = vmul.f32 0.6931472, %v1647_v34  ;;  %v2857_v2 = vmul.f32 %v4315_v12, %v695_v54  ;;  %v4464_v42 = vld [vmem:[#allocation34_spill] sm:$0xff] }
  0xc9   : > { %v1651_v32 = vpop.eup %1650  ;;  %vm2859_vm15 = vcmp.lt.f32.partialorder %v697_v58, 0.0004427343  ;;  %v4337_v19 = vmov 0  ;;  %v722_v23 = vadd.f32 1.0, %v721_v11  ;;  %v645_v15 = vsel %vm2785_vm7, %v2774_v31, %v2837_v4 }
  0xca   : > { %v4338_v19 = vsel %vm2859_vm15, 4294967295, %v4337_v19  ;;  %v2867_v1 = vmul.f32 0.6931472, %v1649_v14  ;;  %vm2869_vm11 = vcmp.lt.f32.partialorder %v706_v46, 0.0004427343  ;;  %v654_v58 = vsel %vm2793_vm5, %v2790_v57, %v2844_v7  ;;  %v4345_v57 = vld [vmem:[#allocation14_spill] sm:$0xff] }
  0xcb   : > { %v733_v22 = vand.u32 2147483647, %v4329_v17  ;;  %v1653_v54 = vpop.eup %1652  ;;  %v2879_v12 = vmul.f32 %v4319_v49, %v704_v51  ;;  %vm2881_vm15 = vcmp.lt.f32.partialorder %v715_v25, 0.0004427343  ;;  %v731_v31 = vadd.f32 1.0, %v730_v33  ;;  %v4351_v14 = vld [vmem:[#allocation79_spill] sm:$0xff] }
  0xcc   : > { %v663_v11 = vsel %vm2799_vm9, %v2808_v30, %v2848_v63  ;;  %v684_v34 = vmul.f32 0.6931472, %v1651_v32  ;;  %v2890_v4 = vmul.f32 %v4320_v52, %v713_v5  ;;  %vm2892_vm7 = vcmp.lt.f32.partialorder %v724_v21, 0.0004427343  ;;  %v4349_v30 = vld [vmem:[#allocation15_spill] sm:$0xff]  ;;  %v4358_v5 = vld [vmem:[#allocation17_spill] sm:$0xff] }
  0xcd   : > { %v1655_v51 = vpop.eup %1654  ;;  %v672_v49 = vsel %vm2810_vm14, %v2820_v16, %v2854_v8  ;;  %v2901_v33 = vmul.f32 %v4324_v35, %v722_v23  ;;  %v4346_v3 = vmax.f32 %v4345_v57, 0.0  ;;  %v4348_v32 = vsel %vm2480_vm0, %v2405_v40, %v2549_v13  ;;  %v4355_v13 = vld [vmem:[#allocation16_spill] sm:$0xff]  ;;  %v4364_v57 = vld [vmem:[#allocation18_spill] sm:$0xff] }
  0xce   : > { %v4350_v46 = vmax.f32 %v4349_v30, 0.0  ;;  %v4352_v55 = vsel %vm2497_vm1, %v2418_v53, %v4351_v14  ;;  %v1657_v35 = vpop.eup %1656  ;;  %v681_v16 = vsel %vm2826_vm12, %v2824_v18, %v2867_v1  ;;  %v693_v7 = vmul.f32 0.6931472, %v1653_v54  ;;  %v4362_v18 = vld [vmem:[#allocation82_spill] sm:$0xff] }
  0xcf   : > { %v2910_v52 = vadd.f32 %v4348_v32, %v4346_v3  ;;  %vm2925_vm5 = vcmp.lt.f32.partialorder %v733_v22, 0.0004427343  ;;  %v4356_v25 = vmax.f32 %v4355_v13, 0.0  ;;  %v4357_v53 = vsel %vm2505_vm2, %v2424_v36, %v2576_v26  ;;  %v4370_v32 = vld [vmem:[#allocation84_spill] sm:$0xff] }
  0xd0   : > { %v2919_v8 = vadd.f32 %v4352_v55, %v4350_v46  ;;  %v4359_v21 = vmax.f32 %v4358_v5, 0.0  ;;  %v4363_v1 = vsel %vm2516_vm3, %v4361_v38, %v4362_v18  ;;  %v2948_v54 = vmul.f32 %v4329_v17, %v731_v31  ;;  %v4372_v17 = vld [vmem:[#allocation20_spill] sm:$0xff]  ;;  %v4375_v55 = vld [vmem:[#allocation21_spill] sm:$0xff]  ;;  %v4391_v18 = vld [vmem:[#allocation75_spill] sm:$0xff] }
  0xd1   : > { %v2936_v45 = vadd.f32 %v4357_v53, %v4356_v25  ;;  %v4365_v3 = vmax.f32 %v4364_v57, 0.0  ;;  %v4366_v26 = vsel %vm2525_vm4, %v2441_v62, %v2600_v29  ;;  %v4368_v63 = vmax.f32 %v4367_v28, 0.0  ;;  %v1659_v62 = vpop.eup %1658  ;;  %v4380_v53 = vld [vmem:[#allocation22_spill] sm:$0xff]  ;;  %v4428_v38 = vld [vmem:[#allocation83_spill] sm:$0xff] }
  0xd2   : > { %v2945_v22 = vadd.f32 %v4363_v1, %v4359_v21  ;;  %vm4369_vm0 = vnez %v4251_v61  ;;  %v4373_v31 = vmax.f32 %v4372_v17, 0.0  ;;  %v690_v29 = vsel %vm2839_vm13, %v2851_v24, %v684_v34  ;;  %v4384_v34 = vld [vmem:[#allocation23_spill] sm:$0xff]  ;;  %v4388_v21 = vld [vmem:[#allocation24_spill] sm:$0xff]  ;;  %v4400_v28 = vld [vmem:[#allocation26_spill] sm:$0xff] }
  0xd3   : > { %v2957_v36 = vadd.f32 %v4366_v26, %v4365_v3  ;;  %v4371_v30 = vsel %vm4369_vm0, %v2448_v41, %v4370_v32  ;;  %v702_v61 = vmul.f32 0.6931472, %v1655_v51  ;;  %v4376_v13 = vmax.f32 %v4375_v55, 0.0  ;;  %v4378_v41 = vld [vmem:[#allocation89_spill] sm:$0xff]  ;;  %v4392_v1 = vld [vmem:[#allocation91_spill] sm:$0xff]  ;;  %v4410_v55 = vld [vmem:[#allocation86_spill] sm:$0xff] }
  0xd4   : > { %v2966_v46 = vadd.f32 %v4371_v30, %v4368_v63  ;;  %v2975_v14 = vadd.f32 %v4374_v0, %v4373_v31  ;;  %vm4377_vm1 = vnez %v4256_v9  ;;  %v4381_v50 = vmax.f32 %v4380_v53, 0.0  ;;  %v4402_v32 = vld [vmem:[#allocation85_spill] sm:$0xff]  ;;  %v4405_v17 = vld [vmem:[#allocation95_spill] sm:$0xff] }
  0xd5   : > { %v4379_v25 = vsel %vm4377_vm1, %v2490_v56, %v4378_v41  ;;  %v4383_v5 = vsel %vm2557_vm8, %v2510_v27, %v2638_v47  ;;  %v711_v24 = vmul.f32 0.6931472, %v1657_v35  ;;  %v4385_v51 = vmax.f32 %v4384_v34, 0.0  ;;  %v4394_v47 = vld [vmem:[#allocation25_spill] sm:$0xff]  ;;  %v4413_v41 = vld [vmem:[#allocation96_spill] sm:$0xff] }
  0xd6   : > { %v2987_v48 = vadd.f32 %v4379_v25, %v4376_v13  ;;  %v2996_v10 = vadd.f32 %v4383_v5, %v4381_v50  ;;  %vm4386_vm2 = vnez %v4261_v6  ;;  %v4389_v23 = vmax.f32 %v4388_v21, 0.0  ;;  %v4397_v6 = vld [vmem:[#allocation92_spill] sm:$0xff]  ;;  %v4404_v30 = vld [vmem:[#allocation77_spill] sm:$0xff]  ;;  %v4412_v13 = vld [vmem:[#allocation78_spill] sm:$0xff] }
  0xd7   : > { %v4387_v56 = vsel %vm4386_vm2, %v2521_v59, %v2640_v20  ;;  %v4393_v57 = vsel %vm2578_vm10, %v4391_v18, %v4392_v1  ;;  %v4395_v35 = vmax.f32 %v4394_v47, 0.0  ;;  %vm4396_vm3 = vnez %v4271_v43  ;;  %v1661_v20 = vpop.eup %1660  ;;  %v4420_v50 = vld [vmem:[#allocation81_spill] sm:$0xff]  ;;  %v4432_v47 = vld [vmem:[#allocation30_spill] sm:$0xff] }
  0xd8   : > { %v3005_v9 = vadd.f32 %v4387_v56, %v4385_v51  ;;  %v3014_v27 = vadd.f32 %v4393_v57, %v4389_v23  ;;  %v4398_v3 = vsel %vm4396_vm3, %v2546_v60, %v4397_v6  ;;  %vm4399_vm4 = vnez %v4338_v19  ;;  %v4408_v60 = vld [vmem:[#allocation27_spill] sm:$0xff]  ;;  %v4416_v19 = vld [vmem:[#allocation28_spill] sm:$0xff]  ;;  %v4424_v56 = vld [vmem:[#allocation29_spill] sm:$0xff] }
  0xd9   : > { %v3023_v59 = vadd.f32 %v4398_v3, %v4395_v35  ;;  %v699_v26 = vsel %vm4399_vm4, %v2857_v2, %v693_v7  ;;  %v4401_v63 = vmax.f32 %v4400_v28, 0.0  ;;  %vm4403_vm6 = vnez %v4402_v32  ;;  %v4418_v7 = vld [vmem:[#allocation87_spill] sm:$0xff]  ;;  %v4426_v23 = vld [vmem:[#allocation90_spill] sm:$0xff]  ;;  %v4429_v18 = vld [vmem:[#allocation101_spill] sm:$0xff] }
  0xda   : > { %v4406_v43 = vsel %vm4403_vm6, %v4404_v30, %v4405_v17  ;;  %v4409_v0 = vmax.f32 %v4408_v60, 0.0  ;;  %vm4411_vm8 = vnez %v4410_v55  ;;  %v4417_v2 = vmax.f32 %v4416_v19, 0.0  ;;  %v4434_v6 = vld [vmem:[#allocation93_spill] sm:$0xff]  ;;  %v4436_v3 = vld [vmem:[#allocation88_spill] sm:$0xff]  ;;  %v4437_v28 = vld [vmem:[#allocation66_spill] sm:$0xff] }
  0xdb   : > { %v3035_v31 = vadd.f32 %v4406_v43, %v4401_v63  ;;  %v4414_v25 = vsel %vm4411_vm8, %v4412_v13, %v4413_v41  ;;  %vm4419_vm9 = vnez %v4418_v7  ;;  %v720_v51 = vmul.f32 0.6931472, %v1659_v62  ;;  %v4440_v62 = vld [vmem:[#allocation31_spill] sm:$0xff]  ;;  %v4442_v17 = vld [vmem:[#allocation98_spill] sm:$0xff] }
  0xdc   : > { %v3044_v53 = vadd.f32 %v4414_v25, %v4409_v0  ;;  %v4422_v5 = vsel %vm4419_vm9, %v4420_v50, %v4421_v37  ;;  %v4425_v21 = vmax.f32 %v4424_v56, 0.0  ;;  %vm4427_vm10 = vnez %v4426_v23  ;;  %v4444_v43 = vld [vmem:[#allocation94_spill] sm:$0xff]  ;;  %v4445_v60 = vld [vmem:[#allocation67_spill] sm:$0xff]  ;;  %v4448_v25 = vld [vmem:[#allocation32_spill] sm:$0xff] }
  0xdd   : > { %4407 = vst [vmem:[#allocation72_spill] sm:$0xff] %v3035_v31  ;;  %v3053_v34 = vadd.f32 %v4422_v5, %v4417_v2  ;;  %v4430_v1 = vsel %vm4427_vm10, %v4428_v38, %v4429_v18  ;;  %v4433_v35 = vmax.f32 %v4432_v47, 0.0  ;;  %vm4435_vm12 = vnez %v4434_v6  ;;  %v3083_v13 = vld [vmem:[%s2113_s29 + $0x98] sm:$0xff]  ;;  %v4450_v2 = vld [vmem:[#allocation100_spill] sm:$0xff]  ;;  %v4453_v50 = vld [vmem:[#allocation105_spill] sm:$0xff] }
  0xde   : > { %4415 = vst [vmem:[#allocation73_spill] sm:$0xff] %v3044_v53  ;;  %v3062_v57 = vadd.f32 %v4430_v1, %v4425_v21  ;;  %v4438_v63 = vsel %vm4435_vm12, %v4436_v3, %v4437_v28  ;;  %v4441_v30 = vmax.f32 %v4440_v62, 0.0  ;;  %vm4443_vm13 = vnez %v4442_v17  ;;  %v4452_v7 = vld [vmem:[#allocation99_spill] sm:$0xff]  ;;  %v4456_v56 = vld [vmem:[#allocation33_spill] sm:$0xff]  ;;  %v4460_v38 = vld [vmem:[#allocation102_spill] sm:$0xff] }
  0xdf   : > { %4423 = vst [vmem:[#allocation14_spill] sm:$0xff] %v3053_v34  ;;  %v3071_v32 = vadd.f32 %v4438_v63, %v4433_v35  ;;  %v4446_v0 = vsel %vm4443_vm13, %v4444_v43, %v4445_v60  ;;  %v708_v41 = vsel %vm2869_vm11, %v2879_v12, %v702_v61  ;;  %v4449_v19 = vmax.f32 %v4448_v25, 0.0  ;;  %v4458_v23 = vld [vmem:[#allocation103_spill] sm:$0xff]  ;;  %v4461_v18 = vld [vmem:[#allocation69_spill] sm:$0xff]  ;;  %v4466_v61 = vld [vmem:[#allocation68_spill] sm:$0xff] }
  0xe0   : > { %4431 = vst [vmem:[#allocation71_spill] sm:$0xff] %v3062_v57  ;;  %v3080_v55 = vadd.f32 %v4446_v0, %v4441_v30  ;;  %vm4451_vm14 = vnez %v4450_v2  ;;  %v4457_v21 = vmax.f32 %v4456_v56, 0.0  ;;  %vm4459_vm0 = vnez %v4458_v23  ;;  %v4468_v35 = vld [vmem:[#allocation104_spill] sm:$0xff]  ;;  %v4469_v6 = vld [vmem:[#allocation70_spill] sm:$0xff]  ;;  %v3119_v62 = vld [vmem:[%s2113_s29 + $0xa8] sm:$0xff] }
  0xe1   : > { %4439 = vst [vmem:[#allocation15_spill] sm:$0xff] %v3071_v32  ;;  %v4454_v37 = vsel %vm4451_vm14, %v4452_v7, %v4453_v50  ;;  %v4462_v1 = vsel %vm4459_vm0, %v4460_v38, %v4461_v18  ;;  %v4465_v12 = vmax.f32 %v4464_v42, 0.0  ;;  %vm4467_vm11 = vnez %v4466_v61  ;;  %v3116_v63 = vld [vmem:[%s2113_s29 + $0xa0] sm:$0xff]  ;;  %v3122_v30 = vld [vmem:[%s2113_s29 + $0xb0] sm:$0xff]  ;;  %v4472_v60 = vld [vmem:[#allocation35_spill] sm:$0xff] }
  0xe2   : > { %4447 = vst [vmem:[#allocation79_spill] sm:$0xff] %v3080_v55  ;;  %v3095_v5 = vadd.f32 %v4454_v37, %v4449_v19  ;;  %v3104_v47 = vadd.f32 %v4462_v1, %v4457_v21  ;;  %v4470_v3 = vsel %vm4467_vm11, %v4468_v35, %v4469_v6  ;;  %v717_v17 = vsel %vm2881_vm15, %v2890_v4, %v711_v24  ;;  %v4475_v19 = vld [vmem:[#allocation36_spill] sm:$0xff]  ;;  %v3136_v50 = vld [vmem:[%s2113_s29 + $0xb8] sm:$0xff]  ;;  %v3142_v56 = vld [vmem:[%s2113_s29 + $0xc8] sm:$0xff] }
  0xe3   : > { %v3113_v28 = vadd.f32 %v4470_v3, %v4465_v12  ;;  %v729_v43 = vmul.f32 0.6931472, %v1661_v20  ;;  %v4473_v0 = vmax.f32 %v4472_v60, 0.0  ;;  %v4476_v2 = vmax.f32 %v4475_v19, 0.0  ;;  %v3139_v37 = vld [vmem:[%s2113_s29 + $0xc0] sm:$0xff]  ;;  %v4481_v20 = vld [vmem:[#allocation38_spill] sm:$0xff] }
  0xe4   : > { %4455 = vst [vmem:[#allocation16_spill] sm:$0xff] %v3095_v5  ;;  %4463 = vst [vmem:[#allocation17_spill] sm:$0xff] %v3104_v47  ;;  %v4479_v4 = vmax.f32 %v4478_v39, 0.0  ;;  %v4484_v23 = vld [vmem:[#allocation39_spill] sm:$0xff]  ;;  %v4487_v18 = vld [vmem:[#allocation40_spill] sm:$0xff] }
  0xe5   : > { %4471 = vst [vmem:[#allocation74_spill] sm:$0xff] %v3113_v28  ;;  %v3129_v25 = vadd.f32 %v645_v15, %v4473_v0  ;;  %v3133_v7 = vadd.f32 %v654_v58, %v4476_v2  ;;  %v4482_v15 = vmax.f32 %v4481_v20, 0.0  ;;  %v4485_v38 = vmax.f32 %v4484_v23, 0.0  ;;  %v3161_v12 = vld [vmem:[%s2113_s29 + $0xd0] sm:$0xff]  ;;  %v3164_v61 = vld [vmem:[%s2113_s29 + $0xd8] sm:$0xff]  ;;  %v3167_v35 = vld [vmem:[%s2113_s29 + $0xe0] sm:$0xff] }
  0xe6   : > { %v3146_v24 = vadd.f32 %v663_v11, %v4479_v4  ;;  %v4488_v1 = vmax.f32 %v4487_v18, 0.0  ;;  %v726_v11 = vsel %vm2892_vm7, %v2901_v33, %v720_v51  ;;  %v3182_v19 = vld [vmem:[%s2113_s29 + $0xe8] sm:$0xff]  ;;  %v3185_v2 = vld [vmem:[%s2113_s29 + $0xf0] sm:$0xff]  ;;  %v3188_v39 = vld [vmem:[%s2113_s29 + $0xf8] sm:$0xff] }
  0xe7   : > { %4474 = vst [vmem:[#allocation65_spill] sm:$0xff] %v3129_v25  ;;  %4477 = vst [vmem:[#allocation82_spill] sm:$0xff] %v3133_v7  ;;  %v3150_v21 = vadd.f32 %v672_v49, %v4482_v15  ;;  %v3154_v58 = vadd.f32 %v681_v16, %v4485_v38  ;;  %v4490_v49 = vld [vmem:[#allocation41_spill] sm:$0xff]  ;;  %v4493_v16 = vld [vmem:[#allocation42_spill] sm:$0xff] }
  0xe8   : > { %4480 = vst [vmem:[#allocation18_spill] sm:$0xff] %v3146_v24  ;;  %v3158_v42 = vadd.f32 %v690_v29, %v4488_v1  ;;  %v4491_v6 = vmax.f32 %v4490_v49, 0.0  ;;  %v4494_v60 = vmax.f32 %v4493_v16, 0.0  ;;  %4496 = vst [vmem:[#allocation22_spill] sm:$0xff] %v3182_v19  ;;  %v4499_v4 = vld [vmem:[#allocation43_spill] sm:$0xff]  ;;  %v4502_v18 = vld [vmem:[#allocation44_spill] sm:$0xff] }
  0xe9   : > { %4483 = vst [vmem:[#allocation19_spill] sm:$0xff] %v3150_v21  ;;  %4486 = vst [vmem:[#allocation84_spill] sm:$0xff] %v3154_v58  ;;  %v4500_v20 = vmax.f32 %v4499_v4, 0.0  ;;  %v4503_v1 = vmax.f32 %v4502_v18, 0.0  ;;  %v4507_v38 = vld [vmem:[#allocation48_spill] sm:$0xff]  ;;  %v4518_v33 = vld [vmem:[#allocation51_spill] sm:$0xff] }
  0xea   : > { %4489 = vst [vmem:[#allocation20_spill] sm:$0xff] %v3158_v42  ;;  %v3174_v3 = vadd.f32 %v699_v26, %v4491_v6  ;;  %v3178_v0 = vadd.f32 %v708_v41, %v4494_v60  ;;  %4497 = vst [vmem:[#allocation76_spill] sm:$0xff] %v3185_v2  ;;  %v735_v41 = vsel %vm2925_vm5, %v2948_v54, %v729_v43  ;;  %v4505_v43 = vld [vmem:[#allocation45_spill] sm:$0xff]  ;;  %v4508_v18 = vmax.f32 %v4507_v38, 0.0  ;;  %v4512_v6 = vld [vmem:[#allocation47_spill] sm:$0xff] }
  0xeb   : > { %4498 = vst [vmem:[#allocation23_spill] sm:$0xff] %v3188_v39  ;;  %v3192_v44 = vadd.f32 %v717_v17, %v4500_v20  ;;  %v3205_v17 = vadd.f32 %v726_v11, %v4503_v1  ;;  %v4506_v4 = vsub.f32 0.0, %v4505_v43  ;;  %v4510_v1 = vld [vmem:[#allocation46_spill] sm:$0xff]  ;;  %v4513_v16 = vsub.f32 0.0, %v4512_v6  ;;  %v4514_v60 = vld [vmem:[#allocation49_spill] sm:$0xff]  ;;  %v4533_v58 = vld [vmem:[#allocation56_spill] sm:$0xff] }
  0xec   : > { %4492 = vst [vmem:[#allocation21_spill] sm:$0xff] %v3174_v3  ;;  %4495 = vst [vmem:[#allocation89_spill] sm:$0xff] %v3178_v0  ;;  %v3219_v11 = vadd.f32 %v735_v41, %v4508_v18  ;;  %v4511_v49 = vsub.f32 0.0, %v4510_v1  ;;  %v4515_v40 = vsub.f32 0.0, %v4514_v60  ;;  %v4516_v54 = vld [vmem:[#allocation50_spill] sm:$0xff]  ;;  %v4519_v38 = vsub.f32 0.0, %v4518_v33 }
  0xed   : > { %4501 = vst [vmem:[#allocation24_spill] sm:$0xff] %v3192_v44  ;;  %4504 = vst [vmem:[#allocation80_spill] sm:$0xff] %v3205_v17  ;;  %v3215_v20 = vmax.f32 %v4506_v4, 0.0  ;;  %v3227_v15 = vmax.f32 %v4513_v16, 0.0  ;;  %v4517_v26 = vsub.f32 0.0, %v4516_v54  ;;  %v4521_v18 = vld [vmem:[#allocation52_spill] sm:$0xff] }
  0xee   : > { %4509 = vst [vmem:[#allocation75_spill] sm:$0xff] %v3219_v11  ;;  %v3223_v23 = vmax.f32 %v4511_v49, 0.0  ;;  %v3231_v51 = vmax.f32 %v4515_v40, 0.0  ;;  %v3239_v41 = vmax.f32 %v4519_v38, 0.0  ;;  %v4522_v29 = vsub.f32 0.0, %v4521_v18  ;;  %v4524_v11 = vld [vmem:[#allocation53_spill] sm:$0xff] }
  0xef   : > { %v3235_v4 = vmax.f32 %v4517_v26, 0.0  ;;  %v4525_v17 = vsub.f32 0.0, %v4524_v11  ;;  %v4527_v44 = vld [vmem:[#allocation54_spill] sm:$0xff]  ;;  %v4530_v3 = vld [vmem:[#allocation55_spill] sm:$0xff]  ;;  %v4534_v21 = vsub.f32 0.0, %v4533_v58  ;;  %v4536_v24 = vld [vmem:[#allocation57_spill] sm:$0xff] }
  0xf0   : > { %4520 = vst [vmem:[#allocation91_spill] sm:$0xff] %v3239_v41  ;;  %v3243_v49 = vmax.f32 %v4522_v29, 0.0  ;;  %v4528_v0 = vsub.f32 0.0, %v4527_v44  ;;  %v4531_v42 = vsub.f32 0.0, %v4530_v3  ;;  %v4537_v7 = vsub.f32 0.0, %v4536_v24  ;;  %v4539_v25 = vld [vmem:[#allocation58_spill] sm:$0xff] }
  0xf1   : > { %v3247_v16 = vmax.f32 %v4525_v17, 0.0  ;;  %v3259_v38 = vmax.f32 %v4534_v21, 0.0  ;;  %v4540_v28 = vsub.f32 0.0, %v4539_v25  ;;  %v4542_v47 = vld [vmem:[#allocation59_spill] sm:$0xff]  ;;  %v4545_v55 = vld [vmem:[#allocation60_spill] sm:$0xff] }
  0xf2   : > { %4523 = vst [vmem:[#allocation25_spill] sm:$0xff] %v3243_v49  ;;  %v3251_v40 = vmax.f32 %v4528_v0, 0.0  ;;  %v3255_v26 = vmax.f32 %v4531_v42, 0.0  ;;  %v3263_v29 = vmax.f32 %v4537_v7, 0.0  ;;  %v4543_v5 = vsub.f32 0.0, %v4542_v47  ;;  %v4552_v7 = vld [vmem:[#allocation62_spill] sm:$0xff] }
  0xf3   : > { %4526 = vst [vmem:[#allocation92_spill] sm:$0xff] %v3247_v16  ;;  %4535 = vst [vmem:[#allocation77_spill] sm:$0xff] %v3259_v38  ;;  %v3267_v17 = vmax.f32 %v4540_v28, 0.0  ;;  %v4546_v32 = vsub.f32 0.0, %v4545_v55  ;;  %v4549_v38 = vld [vmem:[#allocation61_spill] sm:$0xff]  ;;  %v4555_v28 = vld [vmem:[#allocation63_spill] sm:$0xff] }
  0xf4   : > { %4529 = vst [vmem:[#allocation26_spill] sm:$0xff] %v3251_v40  ;;  %4532 = vst [vmem:[#allocation85_spill] sm:$0xff] %v3255_v26  ;;  %v3271_v0 = vmax.f32 %v4543_v5, 0.0  ;;  %v4548_v26 = vsub.f32 0.0, %v4505_v43  ;;  %v4550_v57 = vsub.f32 0.0, %v4549_v38  ;;  %v4558_v5 = vsub.f32 0.0, %v4510_v1 }
  0xf5   : > { %4538 = vst [vmem:[#allocation95_spill] sm:$0xff] %v3263_v29  ;;  %4541 = vst [vmem:[#allocation27_spill] sm:$0xff] %v3267_v17  ;;  %v3275_v42 = vmax.f32 %v4546_v32, 0.0  ;;  %v4553_v29 = vsub.f32 0.0, %v4552_v7  ;;  %v4556_v17 = vsub.f32 0.0, %v4555_v28  ;;  %v4559_v32 = vld [vmem:[#allocation64_spill] sm:$0xff] }
  0xf6   : > { %4544 = vst [vmem:[#allocation86_spill] sm:$0xff] %v3271_v0  ;;  %v832_v21 = vand.u32 2147483647, %v4548_v26  ;;  %v3281_v40 = vmax.f32 %v4550_v57, 0.0  ;;  %v833_v0 = vand.u32 2147483647, %v4558_v5 }
  0xf7   : > { %4547 = vst [vmem:[#allocation78_spill] sm:$0xff] %v3275_v42  ;;  %v3285_v34 = vmax.f32 %v4553_v29, 0.0  ;;  %v3289_v16 = vmax.f32 %v4556_v17, 0.0  ;;  %v4560_v42 = vsub.f32 0.0, %v4559_v32  ;;  %v4562_v43 = vsub.f32 0.0, %v3083_v13 }
  0xf8   : > { %4551 = vst [vmem:[#allocation96_spill] sm:$0xff] %v3281_v40  ;;  %v4564_v57 = vsub.f32 0.0, %v3116_v63  ;;  %v4566_v29 = vsub.f32 0.0, %v4512_v6  ;;  %v4567_v17 = vsub.f32 0.0, %v3119_v62  ;;  %v4569_v1 = vsub.f32 0.0, %v4514_v60 }
  0xf9   : > { %4554 = vst [vmem:[#allocation28_spill] sm:$0xff] %v3285_v34  ;;  %4557 = vst [vmem:[#allocation87_spill] sm:$0xff] %v3289_v16  ;;  %v3295_v53 = vmax.f32 %v4560_v42, 0.0  ;;  %v3299_v26 = vmax.f32 %v4562_v43, 0.0  ;;  %v4570_v42 = vsub.f32 0.0, %v4516_v54  ;;  %v1280_v43 = vadd.f32 %v2919_v8, %v2910_v52 }
  0xfa   : > { %v3303_v40 = vmax.f32 %v4564_v57, 0.0  ;;  %v834_v34 = vand.u32 2147483647, %v4566_v29  ;;  %v3309_v16 = vmax.f32 %v4567_v17, 0.0  ;;  %v835_v5 = vand.u32 2147483647, %v4569_v1 }
  0xfb   : > { %4561 = vst [vmem:[#allocation81_spill] sm:$0xff] %v3295_v53  ;;  %4563 = vst [vmem:[#allocation97_spill] sm:$0xff] %v3299_v26  ;;  %v836_v53 = vand.u32 2147483647, %v4570_v42  ;;  %v4571_v26 = vsub.f32 0.0, %v3122_v30  ;;  %v4573_v6 = vsub.f32 0.0, %v4518_v33 }
  0xfc   : > { %4565 = vst [vmem:[#allocation29_spill] sm:$0xff] %v3303_v40  ;;  %4568 = vst [vmem:[#allocation90_spill] sm:$0xff] %v3309_v16  ;;  %v4574_v40 = vsub.f32 0.0, %v4521_v18  ;;  %v864_v16 = vsub.f32 0.0, %v832_v21  ;;  %v4575_v60 = vsub.f32 0.0, %v3136_v50  ;;  %v4577_v54 = vsub.f32 0.0, %v4524_v11 }
  0xfd   : > { %v3319_v57 = vmax.f32 %v4571_v26, 0.0  ;;  %v837_v29 = vand.u32 2147483647, %v4573_v6  ;;  %v4578_v52 = vsub.f32 0.0, %v4527_v44  ;;  %v865_v49 = vsub.f32 0.0, %v833_v0 }
  0xfe   : > { %v838_v17 = vand.u32 2147483647, %v4574_v40  ;;  %v3327_v1 = vmax.f32 %v4575_v60, 0.0  ;;  %v839_v42 = vand.u32 2147483647, %v4577_v54  ;;  %v4579_v26 = vsub.f32 0.0, %v3139_v37 }
  0xff   : > { %4572 = vst [vmem:[#allocation83_spill] sm:$0xff] %v3319_v57  ;;  %v840_v8 = vand.u32 2147483647, %v4578_v52  ;;  %v4581_v33 = vsub.f32 0.0, %v4530_v3  ;;  %v4582_v40 = vsub.f32 0.0, %v4533_v58  ;;  %v866_v6 = vsub.f32 0.0, %v834_v34 }
 0x100   : > { %4576 = vst [vmem:[#allocation101_spill] sm:$0xff] %v3327_v1  ;;  %v3335_v57 = vmax.f32 %v4579_v26, 0.0  ;;  %v4583_v60 = vsub.f32 0.0, %v4536_v24  ;;  %v4584_v11 = vsub.f32 0.0, %v4539_v25  ;;  %v867_v44 = vsub.f32 0.0, %v835_v5 }
 0x101   : > { %v841_v18 = vand.u32 2147483647, %v4581_v33  ;;  %v842_v21 = vand.u32 2147483647, %v4582_v40  ;;  %v1281_v0 = vadd.f32 %v1280_v43, %v2936_v45  ;;  %v4585_v52 = vsub.f32 0.0, %v3142_v56 }
 0x102   : > { %4580 = vst [vmem:[#allocation30_spill] sm:$0xff] %v3335_v57  ;;  %v843_v1 = vand.u32 2147483647, %v4583_v60  ;;  %v844_v54 = vand.u32 2147483647, %v4584_v11  ;;  %v4587_v3 = vsub.f32 0.0, %v4542_v47 }
 0x103   : > { %v3348_v26 = vmax.f32 %v4585_v52, 0.0  ;;  %v868_v57 = vsub.f32 0.0, %v836_v53  ;;  %v896_v58 = vmul.f32 1.442695, %v864_v16  ;;  %v4588_v34 = vsub.f32 0.0, %v3161_v12 }
 0x104   : > { %v845_v33 = vand.u32 2147483647, %v4587_v3  ;;  %v4590_v24 = vsub.f32 0.0, %v4545_v55  ;;  %v869_v60 = vsub.f32 0.0, %v837_v29  ;;  %v898_v5 = vmul.f32 1.442695, %v865_v49 }
 0x105   : > { %4586 = vst [vmem:[#allocation93_spill] sm:$0xff] %v3348_v26  ;;  %v3354_v40 = vmax.f32 %v4588_v34, 0.0  ;;  %v4591_v45 = vsub.f32 0.0, %v3164_v61  ;;  %v4593_v11 = vsub.f32 0.0, %v4549_v38  ;;  %v870_v47 = vsub.f32 0.0, %v838_v17 }
 0x106   : > { %v846_v25 = vand.u32 2147483647, %v4590_v24  ;;  %v900_v3 = vmul.f32 1.442695, %v866_v6  ;;  %v4594_v53 = vsub.f32 0.0, %v4552_v7  ;;  %v871_v26 = vsub.f32 0.0, %v839_v42 }
 0x107   : > { %4589 = vst [vmem:[#allocation88_spill] sm:$0xff] %v3354_v40  ;;  %v3360_v43 = vmax.f32 %v4591_v45, 0.0  ;;  %v847_v52 = vand.u32 2147483647, %v4593_v11  ;;  %v902_v34 = vmul.f32 1.442695, %v867_v44  ;;  %v1282_v40 = vadd.f32 %v1281_v0, %v2945_v22 }
 0x108   : > { %v848_v16 = vand.u32 2147483647, %v4594_v53  ;;  %v4595_v55 = vsub.f32 0.0, %v4555_v28  ;;  %v872_v49 = vsub.f32 0.0, %v840_v8  ;;  %1662 = vpow2.f32 %v896_v58 }
 0x109   : > { %4592 = vst [vmem:[#allocation66_spill] sm:$0xff] %v3360_v43  ;;  %v904_v24 = vmul.f32 1.442695, %v868_v57  ;;  %v4596_v45 = vsub.f32 0.0, %v4559_v32  ;;  %v873_v38 = vsub.f32 0.0, %v841_v18  ;;  %1664 = vpow2.f32 %v898_v5 }
 0x10a   : > { %v849_v29 = vand.u32 2147483647, %v4595_v55  ;;  %v906_v17 = vmul.f32 1.442695, %v869_v60  ;;  %v4597_v6 = vsub.f32 0.0, %v3083_v13  ;;  %v874_v11 = vsub.f32 0.0, %v842_v21 }
 0x10b   : > { %v850_v43 = vand.u32 2147483647, %v4596_v45  ;;  %1666 = vpow2.f32 %v900_v3  ;;  %v908_v42 = vmul.f32 1.442695, %v870_v47  ;;  %v4598_v22 = vsub.f32 0.0, %v3116_v63 }
 0x10c   : > { %v851_v7 = vand.u32 2147483647, %v4597_v6  ;;  %v875_v28 = vsub.f32 0.0, %v843_v1  ;;  %1668 = vpow2.f32 %v902_v34  ;;  %v910_v8 = vmul.f32 1.442695, %v871_v26 }
 0x10d   : > { %v852_v44 = vand.u32 2147483647, %v4598_v22  ;;  %v4599_v57 = vsub.f32 0.0, %v3119_v62  ;;  %v876_v32 = vsub.f32 0.0, %v844_v54  ;;  %1670 = vpow2.f32 %v904_v24 }
 0x10e   : > { %v912_v18 = vmul.f32 1.442695, %v872_v49  ;;  %v877_v58 = vsub.f32 0.0, %v845_v33  ;;  %1672 = vpow2.f32 %v906_v17  ;;  %v914_v60 = vmul.f32 1.442695, %v873_v38 }
 0x10f   : > { %v853_v0 = vand.u32 2147483647, %v4599_v57  ;;  %v1283_v13 = vadd.f32 %v1282_v40, %v2957_v36  ;;  %v4600_v21 = vsub.f32 0.0, %v3122_v30  ;;  %v878_v47 = vsub.f32 0.0, %v846_v25 }
 0x110   : > { %1674 = vpow2.f32 %v908_v42  ;;  %v916_v63 = vmul.f32 1.442695, %v874_v11  ;;  %v4601_v1 = vsub.f32 0.0, %v3136_v50  ;;  %v879_v3 = vsub.f32 0.0, %v847_v52 }
 0x111   : > { %v854_v5 = vand.u32 2147483647, %v4600_v21  ;;  %1676 = vpow2.f32 %v910_v8  ;;  %v918_v62 = vmul.f32 1.442695, %v875_v28  ;;  %v4602_v54 = vsub.f32 0.0, %v3139_v37 }
 0x112   : > { %v855_v26 = vand.u32 2147483647, %v4601_v1  ;;  %v880_v33 = vsub.f32 0.0, %v848_v16  ;;  %1678 = vpow2.f32 %v912_v18  ;;  %v920_v34 = vmul.f32 1.442695, %v876_v32 }
 0x113   : > { %v856_v53 = vand.u32 2147483647, %v4602_v54  ;;  %v4603_v36 = vsub.f32 0.0, %v3142_v56  ;;  %v881_v30 = vsub.f32 0.0, %v849_v29  ;;  %1680 = vpow2.f32 %v914_v60 }
 0x114   : > { %v922_v25 = vmul.f32 1.442695, %v877_v58  ;;  %v882_v55 = vsub.f32 0.0, %v850_v43  ;;  %1682 = vpow2.f32 %v916_v63  ;;  %v924_v49 = vmul.f32 1.442695, %v878_v47 }
 0x115   : > { %v857_v40 = vand.u32 2147483647, %v4603_v36  ;;  %v1284_v50 = vadd.f32 %v1283_v13, %v2966_v46  ;;  %v4604_v52 = vsub.f32 0.0, %v3161_v12  ;;  %v883_v45 = vsub.f32 0.0, %v851_v7  ;;  %v3391_v29 = vpop.eup %1662 }
 0x116   : > { %1684 = vpow2.f32 %v918_v62  ;;  %v926_v37 = vmul.f32 1.442695, %v879_v3  ;;  %v4605_v16 = vsub.f32 0.0, %v3164_v61  ;;  %v884_v17 = vsub.f32 0.0, %v852_v44  ;;  %v3395_v42 = vpop.eup %1664 }
 0x117   : > { %v858_v24 = vand.u32 2147483647, %v4604_v52  ;;  %1686 = vpow2.f32 %v920_v34  ;;  %v928_v56 = vmul.f32 1.442695, %v880_v33  ;;  %v4606_v43 = vsub.f32 0.0, %v3167_v35 }
 0x118   : > { %v859_v38 = vand.u32 2147483647, %v4605_v16  ;;  %v885_v11 = vsub.f32 0.0, %v853_v0  ;;  %1688 = vpow2.f32 %v922_v25  ;;  %v930_v46 = vmul.f32 1.442695, %v881_v30  ;;  %v3398_v61 = vpop.eup %1666 }
 0x119   : > { %v860_v6 = vand.u32 2147483647, %v4606_v43  ;;  %v886_v12 = vsub.f32 0.0, %v854_v5  ;;  %1690 = vpow2.f32 %v924_v49  ;;  %v932_v7 = vmul.f32 1.442695, %v882_v55  ;;  %v3402_v32 = vpop.eup %1668 }
 0x11a   : > { %v1285_v22 = vadd.f32 %v1284_v50, %v2975_v14  ;;  %v4607_v44 = vsub.f32 0.0, %v3182_v19  ;;  %v887_v8 = vsub.f32 0.0, %v855_v26  ;;  %1692 = vpow2.f32 %v926_v37  ;;  %v3406_v13 = vpop.eup %1670 }
 0x11b   : > { %v934_v57 = vmul.f32 1.442695, %v883_v45  ;;  %v4608_v0 = vsub.f32 0.0, %v3185_v2  ;;  %v888_v58 = vsub.f32 0.0, %v856_v53  ;;  %1694 = vpow2.f32 %v928_v56  ;;  %v3410_v63 = vpop.eup %1672 }
 0x11c   : > { %v861_v28 = vand.u32 2147483647, %v4607_v44  ;;  %v936_v60 = vmul.f32 1.442695, %v884_v17  ;;  %v4609_v14 = vsub.f32 0.0, %v3188_v39  ;;  %v889_v5 = vsub.f32 0.0, %v857_v40 }
 0x11d   : > { %v862_v18 = vand.u32 2147483647, %v4608_v0  ;;  %1696 = vpow2.f32 %v930_v46  ;;  %v938_v47 = vmul.f32 1.442695, %v885_v11  ;;  %v890_v1 = vsub.f32 0.0, %v858_v24  ;;  %v3413_v62 = vpop.eup %1674 }
 0x11e   : > { %v863_v21 = vand.u32 2147483647, %v4609_v14  ;;  %1698 = vpow2.f32 %v932_v7  ;;  %v940_v26 = vmul.f32 1.442695, %v886_v12  ;;  %v1286_v3 = vadd.f32 %v1285_v22, %v2987_v48  ;;  %v3415_v34 = vpop.eup %1676 }
 0x11f   : > { %v891_v54 = vsub.f32 0.0, %v859_v38  ;;  %v892_v53 = vsub.f32 0.0, %v860_v6  ;;  %1700 = vpow2.f32 %v934_v57  ;;  %v942_v33 = vmul.f32 1.442695, %v887_v8  ;;  %v3417_v25 = vpop.eup %1678 }
 0x120   : > { %v893_v36 = vsub.f32 0.0, %v861_v28  ;;  %v894_v30 = vsub.f32 0.0, %v862_v18  ;;  %1702 = vpow2.f32 %v936_v60  ;;  %v944_v40 = vmul.f32 1.442695, %v888_v58  ;;  %v3420_v48 = vpop.eup %1680 }
 0x121   : > { %v895_v55 = vsub.f32 0.0, %v863_v21  ;;  %1704 = vpow2.f32 %v938_v47  ;;  %v946_v49 = vmul.f32 1.442695, %v889_v5  ;;  %v963_v50 = vmul.f32 -0.5, %v3391_v29  ;;  %v3424_v37 = vpop.eup %1682 }
 0x122   : > { %1706 = vpow2.f32 %v940_v26  ;;  %v948_v52 = vmul.f32 1.442695, %v890_v1  ;;  %v972_v24 = vmul.f32 -0.5, %v3395_v42  ;;  %v1287_v45 = vadd.f32 %v1286_v3, %v2996_v10 }
 0x123   : > { %v4610_v16 = vmov %v4606_v43  ;;  %1708 = vpow2.f32 %v942_v33  ;;  %v950_v17 = vmul.f32 1.442695, %v891_v54  ;;  %v952_v56 = vmul.f32 1.442695, %v892_v53  ;;  %v3430_v43 = vpop.eup %1684 }
 0x124   : > { %v3428_v38 = vmax.f32 %v4610_v16, 0.0  ;;  %1710 = vpow2.f32 %v944_v40  ;;  %v954_v6 = vmul.f32 1.442695, %v893_v36  ;;  %v956_v11 = vmul.f32 1.442695, %v894_v30  ;;  %v3433_v12 = vpop.eup %1686 }
 0x125   : > { %v981_v46 = vmul.f32 -0.5, %v3398_v61  ;;  %1712 = vpow2.f32 %v946_v49  ;;  %v958_v10 = vmul.f32 1.442695, %v895_v55  ;;  %v964_v7 = vadd.f32 1.0, %v963_v50  ;;  %v3436_v35 = vpop.eup %1688 }
 0x126   : > { %4611 = vst [vmem:[#allocation31_spill] sm:$0xff] %v3428_v38  ;;  %v990_v22 = vmul.f32 -0.5, %v3402_v32  ;;  %1714 = vpow2.f32 %v948_v52  ;;  %v960_v44 = vadd.f32 1.0, %v3391_v29  ;;  %v973_v28 = vadd.f32 1.0, %v972_v24  ;;  %v3442_v57 = vpop.eup %1690 }
 0x127   : > { %v3440_v8 = vadd.f32 %v1287_v45, %v3005_v9  ;;  %1716 = vpow2.f32 %v950_v17  ;;  %v969_v18 = vadd.f32 1.0, %v3395_v42  ;;  %v3447_v60 = vpop.eup %1692  ;;  %v978_v14 = vadd.f32 1.0, %v3398_v61 }
 0x128   : > { %1718 = vpow2.f32 %v952_v56  ;;  %v982_v21 = vadd.f32 1.0, %v981_v46  ;;  %v999_v5 = vmul.f32 -0.5, %v3406_v13  ;;  %v3451_v47 = vpop.eup %1694  ;;  %v3454_v9 = vmul.f32 %v3391_v29, %v964_v7 }
 0x129   : > { %1720 = vpow2.f32 %v954_v6  ;;  %v991_v26 = vadd.f32 1.0, %v990_v22  ;;  %v3460_v54 = vmul.f32 %v3395_v42, %v973_v28  ;;  %v987_v53 = vadd.f32 1.0, %v3402_v32 }
 0x12a   : > { %v3457_v3 = vpop.eup %1696  ;;  %1722 = vpow2.f32 %v956_v11  ;;  %v1008_v33 = vmul.f32 -0.5, %v3410_v63  ;;  %v996_v40 = vadd.f32 1.0, %v3406_v13  ;;  %v1017_v55 = vmul.f32 -0.5, %v3413_v62 }
 0x12b   : > { %v3464_v36 = vpop.eup %1698  ;;  %1724 = vpow2.f32 %v958_v10  ;;  %v3472_v50 = vmul.f32 %v3398_v61, %v982_v21  ;;  %v1000_v52 = vadd.f32 1.0, %v999_v5  ;;  %v3478_v16 = vmul.f32 %v3402_v32, %v991_v26 }
 0x12c   : > { %v3469_v49 = vpop.eup %1700  ;;  %1726 = vlog2.f32 %v960_v44  ;;  %v1005_v17 = vadd.f32 1.0, %v3410_v63  ;;  %v1026_v56 = vmul.f32 -0.5, %v3415_v34  ;;  %v1009_v11 = vadd.f32 1.0, %v1008_v33 }
 0x12d   : > { %v3475_v45 = vpop.eup %1702  ;;  %1728 = vlog2.f32 %v969_v18  ;;  %v1014_v46 = vadd.f32 1.0, %v3413_v62  ;;  %v1035_v10 = vmul.f32 -0.5, %v3417_v25  ;;  %v1018_v44 = vadd.f32 1.0, %v1017_v55 }
 0x12e   : > { %v3482_v6 = vpop.eup %1704  ;;  %1730 = vlog2.f32 %v978_v14  ;;  %v1023_v28 = vadd.f32 1.0, %v3415_v34  ;;  %v3493_v21 = vmul.f32 %v3406_v13, %v1000_v52  ;;  %v1032_v14 = vadd.f32 1.0, %v3417_v25 }
 0x12f   : > { %4612 = vst [vmem:[#allocation98_spill] sm:$0xff] %v3482_v6  ;;  %v3486_v7 = vpop.eup %1706  ;;  %1732 = vlog2.f32 %v987_v53  ;;  %v1044_v5 = vmul.f32 -0.5, %v3420_v48  ;;  %v1020_v53 = vand.u32 2147483647, %v3413_v62  ;;  %v1027_v33 = vadd.f32 1.0, %v1026_v56 }
 0x130   : > { %4613 = vst [vmem:[#allocation94_spill] sm:$0xff] %v3486_v7  ;;  %v3490_v18 = vpop.eup %1708  ;;  %1734 = vlog2.f32 %v996_v40  ;;  %v1041_v55 = vadd.f32 1.0, %v3420_v48  ;;  %v3504_v24 = vmul.f32 %v3410_v63, %v1009_v11  ;;  %v1029_v40 = vand.u32 2147483647, %v3415_v34 }
 0x131   : > { %4614 = vst [vmem:[#allocation67_spill] sm:$0xff] %v3490_v18  ;;  %v3497_v26 = vpop.eup %1710  ;;  %1736 = vlog2.f32 %v1005_v17  ;;  %v1036_v52 = vadd.f32 1.0, %v1035_v10  ;;  %v3510_v1 = vmul.f32 %v3413_v62, %v1018_v44  ;;  %v1053_v17 = vmul.f32 -0.5, %v3424_v37 }
 0x132   : > { %4615 = vst [vmem:[#allocation32_spill] sm:$0xff] %v3497_v26  ;;  %v3501_v22 = vpop.eup %1712  ;;  %1738 = vlog2.f32 %v1014_v46  ;;  %v1062_v56 = vmul.f32 -0.5, %v3430_v43  ;;  %v1045_v0 = vadd.f32 1.0, %v1044_v5  ;;  %v1050_v11 = vadd.f32 1.0, %v3424_v37 }
 0x133   : > { %4616 = vst [vmem:[#allocation100_spill] sm:$0xff] %v3501_v22  ;;  %v3507_v30 = vpop.eup %1714  ;;  %1740 = vlog2.f32 %v1023_v28  ;;  %v1071_v46 = vmul.f32 -0.5, %v3433_v12  ;;  %v3521_v10 = vmul.f32 %v3415_v34, %v1027_v33  ;;  %v1038_v62 = vand.u32 2147483647, %v3417_v25 }
 0x134   : > { %4617 = vst [vmem:[#allocation99_spill] sm:$0xff] %v3507_v30  ;;  %v3514_v58 = vpop.eup %1716  ;;  %1742 = vlog2.f32 %v1032_v14  ;;  %v1059_v44 = vadd.f32 1.0, %v3430_v43  ;;  %v4621_v38 = vand.u32 2147483647, %v3391_v29  ;;  %v4624_v5 = vand.u32 2147483647, %v3395_v42 }
 0x135   : > { %4618 = vst [vmem:[#allocation105_spill] sm:$0xff] %v3514_v58  ;;  %v3518_v39 = vpop.eup %1718  ;;  %1744 = vlog2.f32 %v1041_v55  ;;  %v3540_v34 = vmul.f32 %v3417_v25, %v1036_v52  ;;  %v1047_v33 = vand.u32 2147483647, %v3420_v48  ;;  %v1068_v55 = vadd.f32 1.0, %v3433_v12 }
 0x136   : > { %4619 = vst [vmem:[#allocation33_spill] sm:$0xff] %v3518_v39  ;;  %v3525_v28 = vpop.eup %1720  ;;  %vm3529_vm15 = vcmp.lt.f32.partialorder %v4621_v38, 0.0004427343  ;;  %vm3535_vm7 = vcmp.lt.f32.partialorder %v4624_v5, 0.0004427343  ;;  %v1080_v19 = vmul.f32 -0.5, %v3436_v35  ;;  %v3558_v52 = vmul.f32 %v3420_v48, %v1045_v0 }
 0x137   : > { %4620 = vst [vmem:[#allocation103_spill] sm:$0xff] %v3525_v28  ;;  %v3545_v29 = vpop.eup %1722  ;;  %v1054_v38 = vadd.f32 1.0, %v1053_v17  ;;  %v1056_v28 = vand.u32 2147483647, %v3424_v37  ;;  %v1063_v39 = vadd.f32 1.0, %v1062_v56  ;;  %v1089_v42 = vmul.f32 -0.5, %v3442_v57 }
 0x138   : > { %4627 = vst [vmem:[#allocation102_spill] sm:$0xff] %v3545_v29  ;;  %v3549_v5 = vpop.eup %1724  ;;  %v4629_v58 = vand.u32 2147483647, %v3398_v61  ;;  %1746 = vlog2.f32 %v1050_v11  ;;  %v1072_v30 = vadd.f32 1.0, %v1071_v46  ;;  %v1077_v17 = vadd.f32 1.0, %v3436_v35 }
 0x139   : > { %4628 = vst [vmem:[#allocation69_spill] sm:$0xff] %v3549_v5  ;;  %v1727_v29 = vpop.eup %1726  ;;  %v4632_v56 = vand.u32 2147483647, %v3402_v32  ;;  %1748 = vlog2.f32 %v1059_v44  ;;  %v1065_v61 = vand.u32 2147483647, %v3430_v43  ;;  %v1098_v5 = vmul.f32 -0.5, %v3447_v60 }
 0x13a   : > { %vm3553_vm5 = vcmp.lt.f32.partialorder %v4629_v58, 0.0004427343  ;;  %v1086_v58 = vadd.f32 1.0, %v3442_v57  ;;  %v1729_v48 = vpop.eup %1728  ;;  %v4635_v0 = vand.u32 2147483647, %v3406_v13  ;;  %1750 = vlog2.f32 %v1068_v55 }
 0x13b   : > { %vm3563_vm1 = vcmp.lt.f32.partialorder %v4632_v56, 0.0004427343  ;;  %v1081_v32 = vadd.f32 1.0, %v1080_v19  ;;  %v1095_v46 = vadd.f32 1.0, %v3447_v60  ;;  %v1107_v56 = vmul.f32 -0.5, %v3451_v47  ;;  %v1731_v44 = vpop.eup %1730 }
 0x13c   : > { %vm3572_vm2 = vcmp.lt.f32.partialorder %v4635_v0, 0.0004427343  ;;  %v4638_v26 = vand.u32 2147483647, %v3410_v63  ;;  %v3585_v7 = vmul.f32 %v3424_v37, %v1054_v38  ;;  %v3588_v13 = vmul.f32 %v3430_v43, %v1063_v39  ;;  %v1733_v0 = vpop.eup %1732 }
 0x13d   : > { %v1074_v55 = vand.u32 2147483647, %v3433_v12  ;;  %v1090_v19 = vadd.f32 1.0, %v1089_v42  ;;  %vm3591_vm4 = vcmp.lt.f32.partialorder %v1020_v53, 0.0004427343  ;;  %v3596_v63 = vmul.f32 %v3433_v12, %v1072_v30  ;;  %v1735_v38 = vpop.eup %1734 }
 0x13e   : > { %vm3580_vm3 = vcmp.lt.f32.partialorder %v4638_v26, 0.0004427343  ;;  %4641 = vst [vmem:[#allocation34_spill] sm:$0xff] %v3588_v13  ;;  %1752 = vlog2.f32 %v1077_v17  ;;  %v1083_v26 = vand.u32 2147483647, %v3436_v35  ;;  %v1104_v37 = vadd.f32 1.0, %v3451_v47  ;;  %v1737_v12 = vpop.eup %1736 }
 0x13f   : > { %4644 = vst [vmem:[#allocation68_spill] sm:$0xff] %v3596_v63  ;;  %v962_v31 = vmul.f32 0.6931472, %v1727_v29  ;;  %v971_v39 = vmul.f32 0.6931472, %v1729_v48  ;;  %1754 = vlog2.f32 %v1086_v58  ;;  %v1099_v42 = vadd.f32 1.0, %v1098_v5  ;;  %v1739_v48 = vpop.eup %1738 }
 0x140   : > { %vm3600_vm6 = vcmp.lt.f32.partialorder %v1029_v40, 0.0004427343  ;;  %vm3604_vm8 = vcmp.lt.f32.partialorder %v1038_v62, 0.0004427343  ;;  %vm3608_vm9 = vcmp.lt.f32.partialorder %v1047_v33, 0.0004427343  ;;  %v3613_v17 = vmul.f32 %v3436_v35, %v1081_v32  ;;  %v1741_v33 = vpop.eup %1740 }
 0x141   : > { %v1092_v29 = vand.u32 2147483647, %v3442_v57  ;;  %1756 = vlog2.f32 %v1095_v46  ;;  %v1108_v40 = vadd.f32 1.0, %v1107_v56  ;;  %v980_v63 = vmul.f32 0.6931472, %v1731_v44  ;;  %v1743_v32 = vpop.eup %1742 }
 0x142   : > { %v3617_v62 = vmul.f32 %v3442_v57, %v1090_v19  ;;  %v1101_v58 = vand.u32 2147483647, %v3447_v60  ;;  %v1116_v5 = vmul.f32 -0.5, %v3457_v3  ;;  %v989_v13 = vmul.f32 0.6931472, %v1733_v0  ;;  %v1745_v0 = vpop.eup %1744 }
 0x143   : > { %1758 = vlog2.f32 %v1104_v37  ;;  %v1110_v41 = vand.u32 2147483647, %v3451_v47  ;;  %v1113_v35 = vadd.f32 1.0, %v3457_v3  ;;  %v968_v46 = vsel %vm3529_vm15, %v3454_v9, %v962_v31 }
 0x144   : > { %4651 = vst [vmem:[#allocation104_spill] sm:$0xff] %v3617_v62  ;;  %v977_v57 = vsel %vm3535_vm7, %v3460_v54, %v971_v39  ;;  %v998_v56 = vmul.f32 0.6931472, %v1735_v38  ;;  %vm3629_vm10 = vcmp.lt.f32.partialorder %v1056_v28, 0.0004427343  ;;  %v3634_v19 = vmul.f32 %v3447_v60, %v1099_v42 }
 0x145   : > { %v1007_v37 = vmul.f32 0.6931472, %v1737_v12  ;;  %v3637_v62 = vmul.f32 %v3451_v47, %v1108_v40  ;;  %v1122_v14 = vadd.f32 1.0, %v3464_v36  ;;  %v1125_v31 = vmul.f32 -0.5, %v3464_v36  ;;  %v1747_v25 = vpop.eup %1746 }
 0x146   : > { %v986_v2 = vsel %vm3553_vm5, %v3472_v50, %v980_v63  ;;  %v3644_v9 = vmul.f32 0.6931472, %v1739_v48  ;;  %vm3646_vm12 = vcmp.lt.f32.partialorder %v1065_v61, 0.0004427343  ;;  %vm3650_vm13 = vcmp.lt.f32.partialorder %v1074_v55, 0.0004427343  ;;  %v1749_v22 = vpop.eup %1748 }
 0x147   : > { %v1117_v47 = vadd.f32 1.0, %v1116_v5  ;;  %v1119_v28 = vand.u32 2147483647, %v3457_v3  ;;  %v995_v38 = vsel %vm3563_vm1, %v3478_v16, %v989_v13  ;;  %v3658_v39 = vmul.f32 0.6931472, %v1741_v33 }
 0x148   : > { %v3660_v50 = vmul.f32 0.6931472, %v1743_v32  ;;  %1760 = vlog2.f32 %v1113_v35  ;;  %v1004_v61 = vsel %vm3572_vm2, %v3493_v21, %v998_v56  ;;  %v3665_v55 = vmul.f32 0.6931472, %v1745_v0 }
 0x149   : > { %vm3667_vm14 = vcmp.lt.f32.partialorder %v1083_v26, 0.0004427343  ;;  %v1248_v42 = vadd.f32 %v968_v46, %v3215_v20  ;;  %v1249_v16 = vadd.f32 %v977_v57, %v3223_v23  ;;  %v1013_v13 = vsel %vm3580_vm3, %v3504_v24, %v1007_v37  ;;  %v1751_v26 = vpop.eup %1750  ;;  %v4669_v37 = vld [vmem:[#allocation72_spill] sm:$0xff] }
 0x14a   : > { %vm3676_vm0 = vcmp.lt.f32.partialorder %v1092_v29, 0.0004427343  ;;  %1762 = vlog2.f32 %v1122_v14  ;;  %v1126_v21 = vadd.f32 1.0, %v1125_v31  ;;  %v1131_v11 = vadd.f32 1.0, %v3469_v49 }
 0x14b   : > { %v1022_v20 = vsel %vm3591_vm4, %v3510_v1, %v3644_v9  ;;  %vm3685_vm11 = vcmp.lt.f32.partialorder %v1101_v58, 0.0004427343  ;;  %v3690_v24 = vmul.f32 %v3457_v3, %v1117_v47  ;;  %v1134_v18 = vmul.f32 -0.5, %v3469_v49  ;;  %v1753_v3 = vpop.eup %1752 }
 0x14c   : > { %v1250_v29 = vadd.f32 %v986_v2, %v3227_v15  ;;  %v1031_v40 = vsel %vm3600_vm6, %v3521_v10, %v3658_v39  ;;  %v1040_v1 = vsel %vm3604_vm8, %v3540_v34, %v3660_v50  ;;  %v3702_v6 = vmul.f32 0.6931472, %v1747_v25  ;;  %v1755_v53 = vpop.eup %1754  ;;  %v4671_v2 = vld [vmem:[#allocation68_spill] sm:$0xff]  ;;  %v4672_v39 = vld [vmem:[#allocation25_spill] sm:$0xff] }
 0x14d   : > { %v1128_v48 = vand.u32 2147483647, %v3464_v36  ;;  %v1049_v15 = vsel %vm3608_vm9, %v3558_v52, %v3665_v55  ;;  %vm3709_vm15 = vcmp.lt.f32.partialorder %v1110_v41, 0.0004427343  ;;  %v1251_v10 = vadd.f32 %v995_v38, %v3231_v51  ;;  %v4673_v25 = vld [vmem:[#allocation73_spill] sm:$0xff] }
 0x14e   : > { %v1289_v43 = vadd.f32 %v3440_v8, %v3014_v27  ;;  %v1312_v34 = vadd.f32 %v1249_v16, %v1248_v42  ;;  %v3716_v5 = vmul.f32 0.6931472, %v1749_v22  ;;  %v3718_v33 = vmul.f32 0.6931472, %v1751_v26  ;;  %v1757_v52 = vpop.eup %1756  ;;  %v4674_v22 = vld [vmem:[#allocation104_spill] sm:$0xff]  ;;  %v4678_v26 = vld [vmem:[#allocation14_spill] sm:$0xff] }
 0x14f   : > { %v3721_v35 = vmul.f32 %v3464_v36, %v1126_v21  ;;  %1764 = vlog2.f32 %v1131_v11  ;;  %v1135_v41 = vadd.f32 1.0, %v1134_v18  ;;  %v1252_v30 = vadd.f32 %v1004_v61, %v3235_v4  ;;  %v4677_v21 = vld [vmem:[#allocation92_spill] sm:$0xff] }
 0x150   : > { %v1290_v32 = vadd.f32 %v1289_v43, %v3023_v59  ;;  %v1313_v51 = vadd.f32 %v1312_v34, %v1250_v29  ;;  %v1058_v27 = vsel %vm3629_vm10, %v3585_v7, %v3702_v6  ;;  %v3729_v8 = vmul.f32 0.6931472, %v1753_v3  ;;  %v1759_v57 = vpop.eup %1758  ;;  %v4668_v59 = vld [vmem:[#allocation91_spill] sm:$0xff]  ;;  %v4670_v7 = vld [vmem:[#allocation34_spill] sm:$0xff] }
 0x151   : > { %v1140_v46 = vadd.f32 1.0, %v3475_v45  ;;  %v1143_v36 = vmul.f32 -0.5, %v3475_v45  ;;  %v3733_v56 = vmul.f32 0.6931472, %v1755_v53  ;;  %vm3735_vm7 = vcmp.lt.f32.partialorder %v1119_v28, 0.0004427343 }
 0x152   : > { %v1253_v4 = vadd.f32 %v1013_v13, %v4668_v59  ;;  %v1291_v14 = vadd.f32 %v1290_v32, %v4669_v37  ;;  %v1314_v31 = vadd.f32 %v1313_v51, %v1251_v10  ;;  %v1067_v44 = vsel %vm3646_vm12, %v4670_v7, %v3716_v5  ;;  %v4679_v29 = vld [vmem:[#allocation98_spill] sm:$0xff] }
 0x153   : > { %v1076_v9 = vsel %vm3650_vm13, %v4671_v2, %v3718_v33  ;;  %v3749_v47 = vmul.f32 0.6931472, %v1757_v52  ;;  %v1137_v28 = vand.u32 2147483647, %v3469_v49  ;;  %v3753_v38 = vmul.f32 %v3469_v49, %v1135_v41  ;;  %v4680_v10 = vld [vmem:[#allocation94_spill] sm:$0xff] }
 0x154   : > { %v1254_v50 = vadd.f32 %v1022_v20, %v4672_v39  ;;  %v1292_v61 = vadd.f32 %v1291_v14, %v4673_v25  ;;  %v1315_v55 = vadd.f32 %v1314_v31, %v1252_v30  ;;  %v1085_v54 = vsel %vm3667_vm14, %v3613_v17, %v3729_v8  ;;  %v4681_v34 = vld [vmem:[#allocation26_spill] sm:$0xff]  ;;  %v4683_v8 = vld [vmem:[#allocation85_spill] sm:$0xff]  ;;  %v4689_v39 = vld [vmem:[#allocation79_spill] sm:$0xff] }
 0x155   : > { %v3761_v42 = vmul.f32 0.6931472, %v1759_v57  ;;  %1766 = vlog2.f32 %v1140_v46  ;;  %v1144_v60 = vadd.f32 1.0, %v1143_v36  ;;  %v1761_v16 = vpop.eup %1760  ;;  %v1094_v49 = vsel %vm3676_vm0, %v4674_v22, %v3733_v56  ;;  %v4710_v22 = vld [vmem:[#allocation82_spill] sm:$0xff] }
 0x156   : > { %vm3767_vm5 = vcmp.lt.f32.partialorder %v1128_v48, 0.0004427343  ;;  %v1255_v11 = vadd.f32 %v1031_v40, %v4677_v21  ;;  %v1293_v20 = vadd.f32 %v1292_v61, %v4678_v26  ;;  %v1316_v63 = vadd.f32 %v1315_v55, %v1253_v4  ;;  %v4682_v40 = vld [vmem:[#allocation71_spill] sm:$0xff]  ;;  %v4692_v26 = vld [vmem:[#allocation16_spill] sm:$0xff] }
 0x157   : > { %v1103_v17 = vsel %vm3685_vm11, %v3634_v19, %v3749_v47  ;;  %v1146_v18 = vand.u32 2147483647, %v3475_v45  ;;  %v1149_v6 = vadd.f32 1.0, %v4679_v29  ;;  %v1152_v3 = vmul.f32 -0.5, %v4679_v29  ;;  %v1763_v48 = vpop.eup %1762  ;;  %v4685_v4 = vld [vmem:[#allocation67_spill] sm:$0xff]  ;;  %v4714_v19 = vld [vmem:[#allocation28_spill] sm:$0xff] }
 0x158   : > { %v1158_v43 = vadd.f32 1.0, %v4680_v10  ;;  %v1256_v53 = vadd.f32 %v1040_v1, %v4681_v34  ;;  %v1294_v5 = vadd.f32 %v1293_v20, %v4682_v40  ;;  %v1317_v33 = vadd.f32 %v1316_v63, %v1254_v50  ;;  %v4684_v1 = vld [vmem:[#allocation15_spill] sm:$0xff]  ;;  %v4695_v34 = vld [vmem:[#allocation17_spill] sm:$0xff] }
 0x159   : > { %v1112_v52 = vsel %vm3709_vm15, %v3637_v62, %v3761_v42  ;;  %v3787_v41 = vmul.f32 0.6931472, %v1761_v16  ;;  %v3790_v30 = vmul.f32 %v3475_v45, %v1144_v60  ;;  %v1155_v32 = vand.u32 2147483647, %v4679_v29  ;;  %v4688_v45 = vld [vmem:[#allocation77_spill] sm:$0xff]  ;;  %v4690_v60 = vld [vmem:[#allocation32_spill] sm:$0xff] }
 0x15a   : > { %v1161_v51 = vmul.f32 -0.5, %v4680_v10  ;;  %v1257_v46 = vadd.f32 %v1049_v15, %v4683_v8  ;;  %v1295_v36 = vadd.f32 %v1294_v5, %v4684_v1  ;;  %v1318_v57 = vadd.f32 %v1317_v33, %v1255_v11  ;;  %v4691_v21 = vld [vmem:[#allocation95_spill] sm:$0xff]  ;;  %v4699_v8 = vld [vmem:[#allocation86_spill] sm:$0xff] }
 0x15b   : > { %1768 = vlog2.f32 %v1149_v6  ;;  %v1153_v59 = vadd.f32 1.0, %v1152_v3  ;;  %v1167_v37 = vadd.f32 1.0, %v4685_v4  ;;  %v1170_v14 = vmul.f32 -0.5, %v4685_v4  ;;  %v4693_v3 = vld [vmem:[#allocation100_spill] sm:$0xff]  ;;  %v4700_v1 = vld [vmem:[#allocation74_spill] sm:$0xff]  ;;  %v4720_v62 = vld [vmem:[#allocation19_spill] sm:$0xff] }
 0x15c   : > { %v1765_v31 = vpop.eup %1764  ;;  %vm3798_vm1 = vcmp.lt.f32.partialorder %v1137_v28, 0.0004427343  ;;  %1770 = vlog2.f32 %v1158_v43  ;;  %v1258_v2 = vadd.f32 %v1058_v27, %v4688_v45  ;;  %v1296_v50 = vadd.f32 %v1295_v36, %v4689_v39  ;;  %v4704_v45 = vld [vmem:[#allocation78_spill] sm:$0xff] }
 0x15d   : > { %v1319_v15 = vadd.f32 %v1318_v57, %v1256_v53  ;;  %v1121_v25 = vsel %vm3735_vm7, %v3690_v24, %v3787_v41  ;;  %v3808_v61 = vmul.f32 0.6931472, %v1763_v48  ;;  %v1164_v55 = vand.u32 2147483647, %v4680_v10  ;;  %v4694_v48 = vld [vmem:[#allocation27_spill] sm:$0xff] }
 0x15e   : > { %v1176_v28 = vadd.f32 1.0, %v4690_v60  ;;  %v1162_v16 = vadd.f32 1.0, %v1161_v51  ;;  %v1259_v11 = vadd.f32 %v1067_v44, %v4691_v21  ;;  %v1297_v20 = vadd.f32 %v1296_v50, %v4692_v26  ;;  %v4711_v21 = vld [vmem:[#allocation103_spill] sm:$0xff] }
 0x15f   : > { %v1320_v27 = vadd.f32 %v1319_v15, %v1257_v46  ;;  %v3815_v63 = vmul.f32 %v4679_v29, %v1153_v59  ;;  %1772 = vlog2.f32 %v1167_v37  ;;  %v1171_v6 = vadd.f32 1.0, %v1170_v14  ;;  %v4696_v29 = vld [vmem:[#allocation99_spill] sm:$0xff]  ;;  %v4701_v59 = vld [vmem:[#allocation105_spill] sm:$0xff] }
 0x160   : > { %v1185_v0 = vadd.f32 1.0, %v4693_v3  ;;  %v1179_v24 = vmul.f32 -0.5, %v4690_v60  ;;  %v1260_v43 = vadd.f32 %v1076_v9, %v4694_v48  ;;  %v1298_v53 = vadd.f32 %v1297_v20, %v4695_v34 }
 0x161   : > { %v1321_v40 = vadd.f32 %v1320_v27, %v1258_v2  ;;  %v1130_v44 = vsel %vm3767_vm5, %v3721_v35, %v3808_v61  ;;  %v1173_v5 = vand.u32 2147483647, %v4685_v4  ;;  %1774 = vlog2.f32 %v1176_v28  ;;  %v4709_v28 = vld [vmem:[#allocation96_spill] sm:$0xff] }
 0x162   : > { %v1194_v33 = vadd.f32 1.0, %v4696_v29  ;;  %v1767_v41 = vpop.eup %1766  ;;  %vm3827_vm2 = vcmp.lt.f32.partialorder %v1146_v18, 0.0004427343  ;;  %v3832_v9 = vmul.f32 %v4680_v10, %v1162_v16  ;;  %v1261_v46 = vadd.f32 %v1085_v54, %v4699_v8  ;;  %v4705_v10 = vld [vmem:[#allocation65_spill] sm:$0xff] }
 0x163   : > { %v1299_v36 = vadd.f32 %v1298_v53, %v4700_v1  ;;  %v1322_v57 = vadd.f32 %v1321_v40, %v1259_v11  ;;  %v1133_v13 = vmul.f32 0.6931472, %v1765_v31  ;;  %1776 = vlog2.f32 %v1185_v0  ;;  %v4724_v1 = vld [vmem:[#allocation81_spill] sm:$0xff] }
 0x164   : > { %v1188_v35 = vmul.f32 -0.5, %v4693_v3  ;;  %v1203_v37 = vadd.f32 1.0, %v4701_v59  ;;  %vm3838_vm3 = vcmp.lt.f32.partialorder %v1155_v32, 0.0004427343  ;;  %v1180_v18 = vadd.f32 1.0, %v1179_v24  ;;  %v4706_v32 = vld [vmem:[#allocation33_spill] sm:$0xff] }
 0x165   : > { %v1262_v54 = vadd.f32 %v1094_v49, %v4704_v45  ;;  %v1300_v2 = vadd.f32 %v1299_v36, %v4705_v10  ;;  %v1323_v31 = vadd.f32 %v1322_v57, %v1260_v43  ;;  %v3850_v39 = vmul.f32 %v4685_v4, %v1171_v6  ;;  %v4716_v24 = vld [vmem:[#allocation102_spill] sm:$0xff]  ;;  %v4719_v43 = vld [vmem:[#allocation87_spill] sm:$0xff] }
 0x166   : > { %v1182_v50 = vand.u32 2147483647, %v4690_v60  ;;  %1778 = vlog2.f32 %v1194_v33  ;;  %v1212_v15 = vadd.f32 1.0, %v4706_v32  ;;  %vm3854_vm4 = vcmp.lt.f32.partialorder %v1164_v55, 0.0004427343 }
 0x167   : > { %v1191_v12 = vand.u32 2147483647, %v4693_v3  ;;  %v1263_v56 = vadd.f32 %v1103_v17, %v4709_v28  ;;  %v1301_v49 = vadd.f32 %v1300_v2, %v4710_v22  ;;  %v1324_v4 = vadd.f32 %v1323_v31, %v1261_v46  ;;  %v4729_v2 = vld [vmem:[#allocation20_spill] sm:$0xff]  ;;  %v4730_v28 = vld [vmem:[#allocation29_spill] sm:$0xff] }
 0x168   : > { %v1139_v16 = vsel %vm3798_vm1, %v3753_v38, %v1133_v13  ;;  %v1189_v55 = vadd.f32 1.0, %v1188_v35  ;;  %1780 = vlog2.f32 %v1203_v37  ;;  %v1221_v11 = vadd.f32 1.0, %v4711_v21  ;;  %v1769_v26 = vpop.eup %1768  ;;  %v4715_v38 = vld [vmem:[#allocation18_spill] sm:$0xff]  ;;  %v4731_v22 = vld [vmem:[#allocation21_spill] sm:$0xff] }
 0x169   : > { %vm3870_vm6 = vcmp.lt.f32.partialorder %v1173_v5, 0.0004427343  ;;  %v3875_v23 = vmul.f32 %v4690_v60, %v1180_v18  ;;  %v1264_v47 = vadd.f32 %v1112_v52, %v4714_v19  ;;  %v1302_v17 = vadd.f32 %v1301_v49, %v4715_v38  ;;  %v1771_v27 = vpop.eup %1770  ;;  %v4721_v5 = vld [vmem:[#allocation69_spill] sm:$0xff]  ;;  %v4732_v19 = vld [vmem:[#allocation90_spill] sm:$0xff] }
 0x16a   : > { %v1325_v7 = vadd.f32 %v1324_v4, %v1262_v54  ;;  %v1142_v6 = vmul.f32 0.6931472, %v1767_v41  ;;  %v1197_v0 = vmul.f32 -0.5, %v4696_v29  ;;  %1782 = vlog2.f32 %v1212_v15  ;;  %v4728_v54 = vld [vmem:[#allocation97_spill] sm:$0xff] }
 0x16b   : > { %v1230_v48 = vadd.f32 1.0, %v4716_v24  ;;  %vm3886_vm8 = vcmp.lt.f32.partialorder %v1182_v50, 0.0004427343  ;;  %v1200_v58 = vand.u32 2147483647, %v4696_v29  ;;  %v1265_v34 = vadd.f32 %v1121_v25, %v4719_v43  ;;  %v4725_v25 = vld [vmem:[#allocation84_spill] sm:$0xff] }
 0x16c   : > { %v1303_v42 = vadd.f32 %v1302_v17, %v4720_v62  ;;  %v1326_v52 = vadd.f32 %v1325_v7, %v1263_v56  ;;  %v1151_v53 = vmul.f32 0.6931472, %v1769_v26  ;;  %v3894_v40 = vmul.f32 %v4693_v3, %v1189_v55  ;;  %v1773_v41 = vpop.eup %1772  ;;  %v4733_v38 = vld [vmem:[#allocation89_spill] sm:$0xff]  ;;  %v4737_v43 = vld [vmem:[#allocation24_spill] sm:$0xff] }
 0x16d   : > { %1784 = vlog2.f32 %v1221_v11  ;;  %v1239_v33 = vadd.f32 1.0, %v4721_v5  ;;  %vm3897_vm9 = vcmp.lt.f32.partialorder %v1191_v12, 0.0004427343  ;;  %v1206_v46 = vmul.f32 -0.5, %v4701_v59 }
 0x16e   : > { %v1266_v36 = vadd.f32 %v1130_v44, %v4724_v1  ;;  %v1304_v57 = vadd.f32 %v1303_v42, %v4725_v25  ;;  %v1327_v13 = vadd.f32 %v1326_v52, %v1264_v47  ;;  %v1148_v3 = vsel %vm3827_vm2, %v3790_v30, %v1142_v6  ;;  %v1775_v18 = vpop.eup %1774 }
 0x16f   : > { %v1160_v35 = vmul.f32 0.6931472, %v1771_v27  ;;  %v1198_v37 = vadd.f32 1.0, %v1197_v0  ;;  %1786 = vlog2.f32 %v1230_v48  ;;  %vm3907_vm10 = vcmp.lt.f32.partialorder %v1200_v58, 0.0004427343  ;;  %v4736_v48 = vld [vmem:[#allocation83_spill] sm:$0xff] }
 0x170   : > { %v1267_v10 = vadd.f32 %v1139_v16, %v4728_v54  ;;  %v1305_v31 = vadd.f32 %v1304_v57, %v4729_v2  ;;  %v1328_v44 = vadd.f32 %v1327_v13, %v1265_v34  ;;  %v1157_v50 = vsel %vm3838_vm3, %v3815_v63, %v1151_v53  ;;  %v1777_v51 = vpop.eup %1776  ;;  %v1344_v13 = vld [vmem:[#allocation7] sm:$0xff]  ;;  %v4743_v54 = vld [vmem:[#allocation75_spill] sm:$0xff] }
 0x171   : > { %v1169_v15 = vmul.f32 0.6931472, %v1773_v41  ;;  %v1209_v30 = vand.u32 2147483647, %v4701_v59  ;;  %1788 = vlog2.f32 %v1239_v33  ;;  %v1207_v12 = vadd.f32 1.0, %v1206_v46  ;;  %v4740_v41 = vld [vmem:[#allocation101_spill] sm:$0xff] }
 0x172   : > { %v1268_v56 = vadd.f32 %v1148_v3, %v4730_v28  ;;  %v1306_v49 = vadd.f32 %v1305_v31, %v4731_v22  ;;  %v1329_v4 = vadd.f32 %v1328_v44, %v1266_v36  ;;  %v1166_v16 = vsel %vm3854_vm4, %v3832_v9, %v1160_v35  ;;  %v4741_v46 = vld [vmem:[#allocation80_spill] sm:$0xff] }
 0x173   : > { %v1178_v55 = vmul.f32 0.6931472, %v1775_v18  ;;  %v1199_v11 = vmul.f32 %v4696_v29, %v1198_v37  ;;  %v1215_v63 = vmul.f32 -0.5, %v4706_v32  ;;  %v1779_v14 = vpop.eup %1778  ;;  %v1218_v26 = vand.u32 2147483647, %v4706_v32  ;;  %v4742_v37 = vld [vmem:[#allocation30_spill] sm:$0xff] }
 0x174   : > { %v1269_v47 = vadd.f32 %v1157_v50, %v4732_v19  ;;  %v1307_v17 = vadd.f32 %v1306_v49, %v4733_v38  ;;  %v1330_v7 = vadd.f32 %v1329_v4, %v1267_v10  ;;  %v1175_v27 = vsel %vm3870_vm6, %v3850_v39, %v1169_v15 }
 0x175   : > { %v1187_v6 = vmul.f32 0.6931472, %v1777_v51  ;;  %vm3930_vm12 = vcmp.lt.f32.partialorder %v1209_v30, 0.0004427343  ;;  %v1224_v29 = vmul.f32 -0.5, %v4711_v21  ;;  %v1781_v61 = vpop.eup %1780  ;;  %v1208_v0 = vmul.f32 %v4701_v59, %v1207_v12  ;;  %v4744_v30 = vld [vmem:[#allocation93_spill] sm:$0xff] }
 0x176   : > { %v1270_v58 = vadd.f32 %v1166_v16, %v4736_v48  ;;  %v1308_v34 = vadd.f32 %v1307_v17, %v4737_v43  ;;  %v1331_v62 = vadd.f32 %v1330_v7, %v1268_v56  ;;  %v1184_v20 = vsel %vm3886_vm8, %v3875_v23, %v1178_v55  ;;  %v4747_v55 = vld [vmem:[#allocation88_spill] sm:$0xff] }
 0x177   : > { %v1196_v39 = vmul.f32 0.6931472, %v1779_v14  ;;  %v1216_v42 = vadd.f32 1.0, %v1215_v63  ;;  %v1233_v52 = vmul.f32 -0.5, %v4716_v24  ;;  %v1783_v53 = vpop.eup %1782  ;;  %vm3942_vm13 = vcmp.lt.f32.partialorder %v1218_v26, 0.0004427343 }
 0x178   : > { %v1271_v59 = vadd.f32 %v1175_v27, %v4740_v41  ;;  %v1309_v1 = vadd.f32 %v1308_v34, %v4741_v46  ;;  %v1332_v36 = vadd.f32 %v1331_v62, %v1269_v47  ;;  %v1193_v25 = vsel %vm3897_vm9, %v3894_v40, %v1187_v6 }
 0x179   : > { %v1205_v23 = vmul.f32 0.6931472, %v1781_v61  ;;  %v1225_v60 = vadd.f32 1.0, %v1224_v29  ;;  %v1242_v57 = vmul.f32 -0.5, %v4721_v5  ;;  %v1227_v35 = vand.u32 2147483647, %v4711_v21 }
 0x17a   : > { %v1785_v3 = vpop.eup %1784  ;;  %v1272_v18 = vadd.f32 %v1184_v20, %v4742_v37  ;;  %v1310_v10 = vadd.f32 %v1309_v1, %v4743_v54  ;;  %v1333_v2 = vadd.f32 %v1332_v36, %v1270_v58  ;;  %v1202_v8 = vsel %vm3907_vm10, %v1199_v11, %v1196_v39 }
 0x17b   : > { %v1214_v40 = vmul.f32 0.6931472, %v1783_v53  ;;  %v1217_v31 = vmul.f32 %v4706_v32, %v1216_v42  ;;  %v1234_v44 = vadd.f32 1.0, %v1233_v52  ;;  %v1236_v15 = vand.u32 2147483647, %v4716_v24 }
 0x17c   : > { %v1787_v50 = vpop.eup %1786  ;;  %v1273_v51 = vadd.f32 %v1193_v25, %v4744_v30  ;;  %v1334_v12 = vadd.f32 %v1333_v2, %v1271_v59  ;;  %v1345_v28 = vadd.f32 %v1344_v13, %v1310_v10  ;;  %v1211_v56 = vsel %vm3930_vm12, %v1208_v0, %v1205_v23 }
 0x17d   : > { %v1223_v22 = vmul.f32 0.6931472, %v1785_v3  ;;  %v1226_v45 = vmul.f32 %v4711_v21, %v1225_v60  ;;  %v1243_v49 = vadd.f32 1.0, %v1242_v57  ;;  %vm3964_vm14 = vcmp.lt.f32.partialorder %v1227_v35, 0.0004427343 }
 0x17e   : > { %v1789_v4 = vpop.eup %1788  ;;  %v1245_v16 = vand.u32 2147483647, %v4721_v5  ;;  %v1274_v11 = vadd.f32 %v1202_v8, %v4747_v55  ;;  %v1335_v63 = vadd.f32 %v1334_v12, %v1272_v18  ;;  %1346 = vst [vmem:[#allocation7] sm:$0xff] %v1345_v28  ;;  %v1220_v14 = vsel %vm3942_vm13, %v1217_v31, %v1214_v40 }
 0x17f   : > { %v1232_v26 = vmul.f32 0.6931472, %v1787_v50  ;;  %v1235_v19 = vmul.f32 %v4716_v24, %v1234_v44 }
 0x180   : > { %1859 = shalt.err (!%p1856_p9)
}
 0x181   : > { %1478 = dma.vmem_to_hbm [thread:$0]  (%p1493_p11), %s1358_s25, 128, %s4021_s2, [#allocation4]   ;;  %v4748_v21 = vld [vmem:[#allocation22_spill] sm:$0xff]  ;;  %vm1237_vm0 = vcmp.lt.f32.partialorder %v1236_v15, 0.0004427343  ;;  %v1336_v7 = vadd.f32 %v1335_v63, %v1273_v51  ;;  %v1229_v27 = vsel %vm3964_vm14, %v1226_v45, %v1223_v22  ;;  %v1244_v9 = vmul.f32 %v4721_v5, %v1243_v49  ;;  %v4751_v29 = vld [vmem:[#allocation76_spill] sm:$0xff] }
 0x182   : > { %v4749_v47 = vsub.f32 0.0, %v4748_v21  ;;  %v4750_v24 = vld [vmem:[#allocation66_spill] sm:$0xff]  ;;  %v1241_v6 = vmul.f32 0.6931472, %v1789_v4  ;;  %v4752_v61 = vsub.f32 0.0, %v4751_v29  ;;  %v4753_v48 = vld [vmem:[#allocation31_spill] sm:$0xff]  ;;  %v1238_v34 = vsel %vm1237_vm0, %v1235_v19, %v1232_v26 }
 0x183   : > { %v1275_v17 = vadd.f32 %v1211_v56, %v4750_v24  ;;  %vm1246_vm11 = vcmp.lt.f32.partialorder %v1245_v16, 0.0004427343  ;;  %v1276_v58 = vadd.f32 %v1220_v14, %v4753_v48  ;;  %v1337_v43 = vadd.f32 %v1336_v7, %v1274_v11  ;;  %v4754_v62 = vld [vmem:[#allocation23_spill] sm:$0xff]  ;;  %v1347_v1 = vld [vmem:[#allocation8] sm:$0xff]  ;;  %s1948_s9 = smov [#allocation8]  }
 0x184   : > { %v829_v38 = vmax.f32 %v4749_v47, 0.0  ;;  %v830_v0 = vmax.f32 %v4752_v61, 0.0  ;;  %v4755_v20 = vsub.f32 0.0, %v4754_v62  ;;  %v1247_v53 = vsel %vm1246_vm11, %v1244_v9, %v1241_v6  ;;  %s1368_s27 = sshll.u32 %s1948_s9, 4  ;;  %s1369_s27 = int_to_ptr.vmem [resolvable:$true] %s1368_s27 }
 0x185   : > { %v1338_v52 = vadd.f32 %v1337_v43, %v1275_v17  ;;  %s1870_s15 = scalar_lea.vmem %s1369_s27, 128  ;;  %p1877_p5 = scmp.lt.s32.totalorder %s1369_s27, %s1369_s27 }
 0x186   : > { %v831_v39 = vmax.f32 %v4755_v20, 0.0  ;;  %v1277_v42 = vadd.f32 %v1229_v27, %v829_v38  ;;  %v1278_v33 = vadd.f32 %v1238_v34, %v830_v0  ;;  %p1871_p13 = scmp.ne.s32.totalorder %s1369_s27, %s1870_s15  ;;  %p1878_p7 = scmp.lt.s32.totalorder %s1870_s15, %s1870_s15 }
 0x187   : > { %v1339_v41 = vadd.f32 %v1338_v52, %v1276_v58 }
 0x188   : > { %v1279_v59 = vadd.f32 %v1247_v53, %v831_v39  ;;  %p1872_p2 = pnand %p1871_p13, %p1493_p11  ;;  %p1879_p8 = por %p1878_p7, %p1877_p5 }
 0x189   : > { %v1340_v46 = vadd.f32 %v1339_v41, %v1277_v42 }
 0x18a   : > { %p1873_p3 = pneg %p1872_p2 }
 0x18b   : > { %v1341_v5 = vadd.f32 %v1340_v46, %v1278_v33 }
 0x18c   : > { %p1880_p1 = pnand %p1879_p8, %p1873_p3 }
 0x18d   : > { %v1342_v36 = vadd.f32 %v1341_v5, %v1279_v59 }
 0x18f   : > { %v1348_v25 = vadd.f32 %v1347_v1, %v1342_v36 }
 0x191   : > { %1349 = vst [vmem:[#allocation8] sm:$0xff] %v1348_v25 }
 0x192   : > { %1883 = shalt.err (!%p1880_p1)
}
 0x193   : > { %1480 = dma.vmem_to_hbm [thread:$0]  (%p1493_p11), %s1369_s27, 128, %s4022_s3, [#allocation9]  }
 0x194   : > { %1919 = dma.done.wait (%p1493_p11), [#allocation4], 128  }
 0x195   : > { %1921 = vsyncadd (%p1493_p11), [#allocation4], 4294967168 }
 0x196   : > { %1923 = dma.done.wait (%p1493_p11), [#allocation9], 128  }
 0x197   : > { %1925 = vsyncadd (%p1493_p11), [#allocation9], 4294967168 }
 0x198 PF: > { %p19_p4 = scmp.ge.s32.totalorder %s1991_s17, 4   ;;  %s4756_s12 = smov %s1932_s13 }
 0x199   : > { %s4757_s13 = smov %s1936_s14  ;;  %s4758_s14 = smov %s2001_s20 }
 0x19a   : > { %s4759_s15 = smov %s1991_s17  ;;  %21 = sbr.rel (!%p19_p4) target bundleno = 7 (0x7), region = 90 }
 0x19f   :  { %1385 = vsyncpa [#allocation3], 1 }
 0x1a0   :  { %1387 = vsyncpa [#allocation3 + $0x1], 1 }
 0x1a1   :  { %1388 = vsyncpa [#allocation6], 1 }
 0x1a2   :  { %1390 = vsyncpa [#allocation6 + $0x1], 1 }
 0x1a3   :  { %1391 = vsyncpa [#allocation4], 1 }
 0x1a4   :  { %1393 = vsyncpa [#allocation4 + $0x1], 1 }
 0x1a5   :  { %1394 = vsyncpa [#allocation9], 1 }

</bundles_post_ra>
